<compile_context>
chip_gen: v7x
topology: tpu7x:2x2x1
jax: 0.10.0
libtpu: 0.0.40
codegen_flags: <defaults>
</compile_context>

<pallas_src>
import functools

import jax
import jax.numpy as jnp
import numpy as np
from jax.experimental import pallas as pl
from jax.experimental.pallas import tpu as pltpu


# ------------------------------ Pallas kernel ------------------------------ #

def _rotate_lanes(t, offset, size):
    """result[:, i] = t[:, (i + offset) % size] (static-offset lane rotation)."""
    o = offset % size
    if o == 0:
        return t
    return jnp.concatenate([t[:, o:], t[:, :o]], axis=1)


def _inception_kernel(coords_ref, x_ref, wh_ref, bh_ref, w2_ref, b2_ref,
                      w3_ref, b3_ref, w4_ref, b4_ref, o_ref, *,
                      H, W, c1, c2_0, c2_1, c3_1):
    hw = H * W
    x = x_ref[0]                       # (Cin, H*W) -- spatial on the lane dim
    hh = coords_ref[0:1, :]            # (1, H*W) row index of each position
    ww = coords_ref[1:2, :]            # (1, H*W) col index of each position

    # Boundary-validity masks for every tap offset used below (5x5 is max).
    masks = {}
    for dy in range(-2, 3):
        for dx in range(-2, 3):
            masks[(dy, dx)] = ((hh >= -dy) & (hh < H - dy) &
                               (ww >= -dx) & (ww < W - dx))

    def shifted(t, dy, dx, pad_value):
        # value at (h, w) becomes t at (h+dy, w+dx); outside the image -> pad.
        s = _rotate_lanes(t, dy * W + dx, hw)
        return jnp.where(masks[(dy, dx)], s, pad_value)

    def conv(t, w_ref_, b_ref_, K):
        # KxK stride-1 'same' conv as one matmul: (Cout,K*K*C) @ (K*K*C, HW).
        p = K // 2
        taps = [shifted(t, ky - p, kx - p, 0.0)
                for ky in range(K) for kx in range(K)]
        patches = jnp.concatenate(taps, axis=0)
        return jnp.dot(w_ref_[...], patches,
                       preferred_element_type=jnp.float32) + b_ref_[...]

    # Fused 1x1 head: p1_1 / p2_1 / p3_1 share the same input -> one matmul.
    head = jnp.dot(wh_ref[...], x, preferred_element_type=jnp.float32)
    head = head + bh_ref[...]
    x1 = jnp.maximum(head[0:c1, :], 0.0)            # relu(p1_1(x))
    t2 = head[c1:c1 + c2_0, :]                      # p2_1(x)  (no relu, as in spec)
    t3 = head[c1 + c2_0:, :]                        # p3_1(x)  (no relu, as in spec)

    x2 = jnp.maximum(conv(t2, w2_ref, b2_ref, 3), 0.0)   # relu(p2_2(.))
    x3 = jnp.maximum(conv(t3, w3_ref, b3_ref, 5), 0.0)   # relu(p3_2(.))

    # Branch 4: 3x3 / stride-1 / pad-1 max-pool, then 3x3 conv + relu.
    pooled = x
    for ky in range(3):
        for kx in range(3):
            if ky == 1 and kx == 1:
                continue
            pooled = jnp.maximum(pooled, shifted(x, ky - 1, kx - 1, -jnp.inf))
    x4 = jnp.maximum(conv(pooled, w4_ref, b4_ref, 3), 0.0)

    # Channel concat: write each branch into its channel slice of the output.
    dt = o_ref.dtype
    o_ref[0, 0:c1, :] = x1.astype(dt)
    o_ref[0, c1:c1 + c2_1, :] = x2.astype(dt)
    o_ref[0, c1 + c2_1:c1 + c2_1 + c3_1, :] = x3.astype(dt)
    o_ref[0, c1 + c2_1 + c3_1:, :] = x4.astype(dt)


# --------------------------------- wrapper ---------------------------------- #

def _im2col_weight(w):
    """(Cout, Cin, K, K) torch-layout weight -> (Cout, K*K*Cin) matmul weight
    whose column order matches the tap-major patch stacking in the kernel."""
    co, ci, kh, kw = w.shape
    return jnp.transpose(w, (0, 2, 3, 1)).reshape(co, kh * kw * ci)


@jax.jit
def inception_forward(x_nchw, params):
    """Matches Inception.forward: four branches, concat on the channel dim."""
    N, Cin, H, W = x_nchw.shape
    hw = H * W
    c1 = params["w1"].shape[0]
    c2_0, c2_1 = params["w2a"].shape[0], params["w2b"].shape[0]
    c3_0, c3_1 = params["w3a"].shape[0], params["w3b"].shape[0]
    c4 = params["w4"].shape[0]
    c_total = c1 + c2_1 + c3_1 + c4

    # Fused 1x1 head weights (p1_1, p2_1, p3_1).
    w_head = jnp.concatenate([params["w1"].reshape(c1, Cin),
                              params["w2a"].reshape(c2_0, Cin),
                              params["w3a"].reshape(c3_0, Cin)], axis=0)
    b_head = jnp.concatenate([params["b1"], params["b2a"],
                              params["b3a"]]).reshape(-1, 1)
    w2 = _im2col_weight(params["w2b"]); b2 = params["b2b"].reshape(-1, 1)
    w3 = _im2col_weight(params["w3b"]); b3 = params["b3b"].reshape(-1, 1)
    w4 = _im2col_weight(params["w4"]);  b4 = params["b4"].reshape(-1, 1)

    # Static (h, w) coordinates of each flattened spatial position (for masks).
    coords = jnp.asarray(
        np.stack([np.repeat(np.arange(H, dtype=np.int32), W),
                  np.tile(np.arange(W, dtype=np.int32), H)], axis=0))

    x_flat = x_nchw.reshape(N, Cin, hw)        # free reshape (stays NCHW order)

    kernel = functools.partial(_inception_kernel, H=H, W=W, c1=c1,
                               c2_0=c2_0, c2_1=c2_1, c3_1=c3_1)
    rep = lambda n: (0, 0)
    out = pl.pallas_call(
        kernel,
        out_shape=jax.ShapeDtypeStruct((N, c_total, hw), x_nchw.dtype),
        grid=(N,),
        in_specs=[
            pl.BlockSpec((2, hw), rep),
            pl.BlockSpec((1, Cin, hw), lambda n: (n, 0, 0)),
            pl.BlockSpec(w_head.shape, rep),
            pl.BlockSpec(b_head.shape, rep),
            pl.BlockSpec(w2.shape, rep),
            pl.BlockSpec(b2.shape, rep),
            pl.BlockSpec(w3.shape, rep),
            pl.BlockSpec(b3.shape, rep),
            pl.BlockSpec(w4.shape, rep),
            pl.BlockSpec(b4.shape, rep),
        ],
        out_specs=pl.BlockSpec((1, c_total, hw), lambda n: (n, 0, 0)),
        compiler_params=pltpu.CompilerParams(
            dimension_semantics=("parallel",)),
    )(coords, x_flat, w_head, b_head, w2, b2, w3, b3, w4, b4)

    return out.reshape(N, c_total, H, W)


# ------------------------ params + pure-JAX reference ----------------------- #

def init_params(key, in_ch, c1, c2, c3, c4):
    ks = jax.random.split(key, 12)

    def w(k, kk, cin, cout):   # PyTorch OIHW layout
        return 0.1 * jax.random.normal(k, (cout, cin, kk, kk), jnp.float32)

    def b(k, cout):
        return 0.1 * jax.random.normal(k, (cout,), jnp.float32)

    return {
        "w1":  w(ks[0], 1, in_ch, c1),      "b1":  b(ks[1], c1),
        "w2a": w(ks[2], 1, in_ch, c2[0]),   "b2a": b(ks[3], c2[0]),
        "w2b": w(ks[4], 3, c2[0], c2[1]),   "b2b": b(ks[5], c2[1]),
        "w3a": w(ks[6], 1, in_ch, c3[0]),   "b3a": b(ks[7], c3[0]),
        "w3b": w(ks[8], 5, c3[0], c3[1]),   "b3b": b(ks[9], c3[1]),
        "w4":  w(ks[10], 3, in_ch, c4),     "b4":  b(ks[11], c4),
    }


def _conv_ref(x, w, b):
    p = w.shape[2] // 2
    y = jax.lax.conv_general_dilated(
        x, w, window_strides=(1, 1), padding=[(p, p), (p, p)],
        dimension_numbers=("NCHW", "OIHW", "NCHW"),
        precision=jax.lax.Precision.HIGHEST)
    return y + b[None, :, None, None]


def inception_ref(x, p):
    x1 = jax.nn.relu(_conv_ref(x, p["w1"], p["b1"]))
    x2 = jax.nn.relu(_conv_ref(_conv_ref(x, p["w2a"], p["b2a"]),
                               p["w2b"], p["b2b"]))
    x3 = jax.nn.relu(_conv_ref(_conv_ref(x, p["w3a"], p["b3a"]),
                               p["w3b"], p["b3b"]))
    pooled = jax.lax.reduce_window(
        x, -jnp.inf, jax.lax.max, (1, 1, 3, 3), (1, 1, 1, 1),
        padding=((0, 0), (0, 0), (1, 1), (1, 1)))
    x4 = jax.nn.relu(_conv_ref(pooled, p["w4"], p["b4"]))
    return jnp.concatenate([x1, x2, x3, x4], axis=1)


# ----------------------------------- main ----------------------------------- #

if __name__ == "__main__":
    key = jax.random.PRNGKey(0)
    k_x, k_p = jax.random.split(key)

    N, Cin, H, W = 2, 4, 16, 16
    c1, c2, c3, c4 = 8, (4, 8), (4, 8), 8

    x = jax.random.normal(k_x, (N, Cin, H, W), jnp.float32)   # NCHW like torch
    params = init_params(k_p, Cin, c1, c2, c3, c4)

    out = jax.block_until_ready(inception_forward(x, params))

    expected_channels = c1 + c2[1] + c3[1] + c4
    assert out.shape == (N, expected_channels, H, W), out.shape

    ref = jax.block_until_ready(inception_ref(x, params))
    max_err = float(jnp.max(jnp.abs(out - ref)))
    # Tolerance allows for possible reduced-precision MXU passes on f32 matmuls
    # (accumulation is f32 either way); structural errors are O(0.1) and caught.
    assert jnp.allclose(out, ref, atol=5e-3, rtol=5e-3), f"mismatch: {max_err}"

    print("KERNEL_OK")
</pallas_src>

<mosaic_0001>
module attributes {stable_mosaic.version = 11 : i64} {
  func.func @_inception_kernel(%arg0: i32, %arg1: memref<2x256xi32, #tpu.memory_space<vmem>>, %arg2: memref<1x4x256xf32, #tpu.memory_space<vmem>>, %arg3: memref<16x4xf32, #tpu.memory_space<vmem>>, %arg4: memref<16x1xf32, #tpu.memory_space<vmem>>, %arg5: memref<8x36xf32, #tpu.memory_space<vmem>>, %arg6: memref<8x1xf32, #tpu.memory_space<vmem>>, %arg7: memref<8x100xf32, #tpu.memory_space<vmem>>, %arg8: memref<8x1xf32, #tpu.memory_space<vmem>>, %arg9: memref<8x36xf32, #tpu.memory_space<vmem>>, %arg10: memref<8x1xf32, #tpu.memory_space<vmem>>, %arg11: memref<1x32x256xf32, #tpu.memory_space<vmem>>) attributes {dimension_semantics = [#tpu.dimension_semantics<parallel>], iteration_bounds = array<i64: 2>, scalar_prefetch = 0 : i64, scratch_operands = 0 : i64, tpu.core_type = #tpu.core_type<tc>, window_params = [{pipeline_mode = #tpu.pipeline_mode<synchronous>, transform_indices = @transform_0, window_bounds = array<i64: 2, 256>}, {transform_indices = @transform_1, window_bounds = array<i64: 1, 4, 256>}, {pipeline_mode = #tpu.pipeline_mode<synchronous>, transform_indices = @transform_2, window_bounds = array<i64: 16, 4>}, {pipeline_mode = #tpu.pipeline_mode<synchronous>, transform_indices = @transform_3, window_bounds = array<i64: 16, 1>}, {pipeline_mode = #tpu.pipeline_mode<synchronous>, transform_indices = @transform_4, window_bounds = array<i64: 8, 36>}, {pipeline_mode = #tpu.pipeline_mode<synchronous>, transform_indices = @transform_5, window_bounds = array<i64: 8, 1>}, {pipeline_mode = #tpu.pipeline_mode<synchronous>, transform_indices = @transform_6, window_bounds = array<i64: 8, 100>}, {pipeline_mode = #tpu.pipeline_mode<synchronous>, transform_indices = @transform_7, window_bounds = array<i64: 8, 1>}, {pipeline_mode = #tpu.pipeline_mode<synchronous>, transform_indices = @transform_8, window_bounds = array<i64: 8, 36>}, {pipeline_mode = #tpu.pipeline_mode<synchronous>, transform_indices = @transform_9, window_bounds = array<i64: 8, 1>}, {transform_indices = @transform_10, window_bounds = array<i64: 1, 32, 256>}]} {
    %c0 = arith.constant 0 : index
    %c0_0 = arith.constant 0 : index
    %c0_1 = arith.constant 0 : index
    %0 = vector.load %arg2[%c0, %c0_0, %c0_1] : memref<1x4x256xf32, #tpu.memory_space<vmem>>, vector<1x4x256xf32>
    %1 = vector.shape_cast %0 : vector<1x4x256xf32> to vector<4x256xf32>
    %c0_2 = arith.constant 0 : index
    %c0_3 = arith.constant 0 : index
    %2 = vector.load %arg1[%c0_2, %c0_3] : memref<2x256xi32, #tpu.memory_space<vmem>>, vector<1x256xi32>
    %c1 = arith.constant 1 : index
    %c0_4 = arith.constant 0 : index
    %3 = vector.load %arg1[%c1, %c0_4] : memref<2x256xi32, #tpu.memory_space<vmem>>, vector<1x256xi32>
    %c2_i32 = arith.constant 2 : i32
    %4 = vector.broadcast %c2_i32 : i32 to vector<1x256xi32>
    %5 = arith.cmpi sge, %2, %4 : vector<1x256xi32>
    %c18_i32 = arith.constant 18 : i32
    %6 = vector.broadcast %c18_i32 : i32 to vector<1x256xi32>
    %7 = arith.cmpi slt, %2, %6 : vector<1x256xi32>
    %8 = arith.andi %5, %7 : vector<1x256xi1>
    %c2_i32_5 = arith.constant 2 : i32
    %9 = vector.broadcast %c2_i32_5 : i32 to vector<1x256xi32>
    %10 = arith.cmpi sge, %3, %9 : vector<1x256xi32>
    %11 = arith.andi %8, %10 : vector<1x256xi1>
    %c18_i32_6 = arith.constant 18 : i32
    %12 = vector.broadcast %c18_i32_6 : i32 to vector<1x256xi32>
    %13 = arith.cmpi slt, %3, %12 : vector<1x256xi32>
    %14 = arith.andi %11, %13 : vector<1x256xi1>
    %c2_i32_7 = arith.constant 2 : i32
    %15 = vector.broadcast %c2_i32_7 : i32 to vector<1x256xi32>
    %16 = arith.cmpi sge, %2, %15 : vector<1x256xi32>
    %c18_i32_8 = arith.constant 18 : i32
    %17 = vector.broadcast %c18_i32_8 : i32 to vector<1x256xi32>
    %18 = arith.cmpi slt, %2, %17 : vector<1x256xi32>
    %19 = arith.andi %16, %18 : vector<1x256xi1>
    %c1_i32 = arith.constant 1 : i32
    %20 = vector.broadcast %c1_i32 : i32 to vector<1x256xi32>
    %21 = arith.cmpi sge, %3, %20 : vector<1x256xi32>
    %22 = arith.andi %19, %21 : vector<1x256xi1>
    %c17_i32 = arith.constant 17 : i32
    %23 = vector.broadcast %c17_i32 : i32 to vector<1x256xi32>
    %24 = arith.cmpi slt, %3, %23 : vector<1x256xi32>
    %25 = arith.andi %22, %24 : vector<1x256xi1>
    %c2_i32_9 = arith.constant 2 : i32
    %26 = vector.broadcast %c2_i32_9 : i32 to vector<1x256xi32>
    %27 = arith.cmpi sge, %2, %26 : vector<1x256xi32>
    %c18_i32_10 = arith.constant 18 : i32
    %28 = vector.broadcast %c18_i32_10 : i32 to vector<1x256xi32>
    %29 = arith.cmpi slt, %2, %28 : vector<1x256xi32>
    %30 = arith.andi %27, %29 : vector<1x256xi1>
    %c0_i32 = arith.constant 0 : i32
    %31 = vector.broadcast %c0_i32 : i32 to vector<1x256xi32>
    %32 = arith.cmpi sge, %3, %31 : vector<1x256xi32>
    %33 = arith.andi %30, %32 : vector<1x256xi1>
    %c16_i32 = arith.constant 16 : i32
    %34 = vector.broadcast %c16_i32 : i32 to vector<1x256xi32>
    %35 = arith.cmpi slt, %3, %34 : vector<1x256xi32>
    %36 = arith.andi %33, %35 : vector<1x256xi1>
    %c2_i32_11 = arith.constant 2 : i32
    %37 = vector.broadcast %c2_i32_11 : i32 to vector<1x256xi32>
    %38 = arith.cmpi sge, %2, %37 : vector<1x256xi32>
    %c18_i32_12 = arith.constant 18 : i32
    %39 = vector.broadcast %c18_i32_12 : i32 to vector<1x256xi32>
    %40 = arith.cmpi slt, %2, %39 : vector<1x256xi32>
    %41 = arith.andi %38, %40 : vector<1x256xi1>
    %c-1_i32 = arith.constant -1 : i32
    %42 = vector.broadcast %c-1_i32 : i32 to vector<1x256xi32>
    %43 = arith.cmpi sge, %3, %42 : vector<1x256xi32>
    %44 = arith.andi %41, %43 : vector<1x256xi1>
    %c15_i32 = arith.constant 15 : i32
    %45 = vector.broadcast %c15_i32 : i32 to vector<1x256xi32>
    %46 = arith.cmpi slt, %3, %45 : vector<1x256xi32>
    %47 = arith.andi %44, %46 : vector<1x256xi1>
    %c2_i32_13 = arith.constant 2 : i32
    %48 = vector.broadcast %c2_i32_13 : i32 to vector<1x256xi32>
    %49 = arith.cmpi sge, %2, %48 : vector<1x256xi32>
    %c18_i32_14 = arith.constant 18 : i32
    %50 = vector.broadcast %c18_i32_14 : i32 to vector<1x256xi32>
    %51 = arith.cmpi slt, %2, %50 : vector<1x256xi32>
    %52 = arith.andi %49, %51 : vector<1x256xi1>
    %c-2_i32 = arith.constant -2 : i32
    %53 = vector.broadcast %c-2_i32 : i32 to vector<1x256xi32>
    %54 = arith.cmpi sge, %3, %53 : vector<1x256xi32>
    %55 = arith.andi %52, %54 : vector<1x256xi1>
    %c14_i32 = arith.constant 14 : i32
    %56 = vector.broadcast %c14_i32 : i32 to vector<1x256xi32>
    %57 = arith.cmpi slt, %3, %56 : vector<1x256xi32>
    %58 = arith.andi %55, %57 : vector<1x256xi1>
    %c1_i32_15 = arith.constant 1 : i32
    %59 = vector.broadcast %c1_i32_15 : i32 to vector<1x256xi32>
    %60 = arith.cmpi sge, %2, %59 : vector<1x256xi32>
    %c17_i32_16 = arith.constant 17 : i32
    %61 = vector.broadcast %c17_i32_16 : i32 to vector<1x256xi32>
    %62 = arith.cmpi slt, %2, %61 : vector<1x256xi32>
    %63 = arith.andi %60, %62 : vector<1x256xi1>
    %c2_i32_17 = arith.constant 2 : i32
    %64 = vector.broadcast %c2_i32_17 : i32 to vector<1x256xi32>
    %65 = arith.cmpi sge, %3, %64 : vector<1x256xi32>
    %66 = arith.andi %63, %65 : vector<1x256xi1>
    %c18_i32_18 = arith.constant 18 : i32
    %67 = vector.broadcast %c18_i32_18 : i32 to vector<1x256xi32>
    %68 = arith.cmpi slt, %3, %67 : vector<1x256xi32>
    %69 = arith.andi %66, %68 : vector<1x256xi1>
    %c1_i32_19 = arith.constant 1 : i32
    %70 = vector.broadcast %c1_i32_19 : i32 to vector<1x256xi32>
    %71 = arith.cmpi sge, %2, %70 : vector<1x256xi32>
    %c17_i32_20 = arith.constant 17 : i32
    %72 = vector.broadcast %c17_i32_20 : i32 to vector<1x256xi32>
    %73 = arith.cmpi slt, %2, %72 : vector<1x256xi32>
    %74 = arith.andi %71, %73 : vector<1x256xi1>
    %c1_i32_21 = arith.constant 1 : i32
    %75 = vector.broadcast %c1_i32_21 : i32 to vector<1x256xi32>
    %76 = arith.cmpi sge, %3, %75 : vector<1x256xi32>
    %77 = arith.andi %74, %76 : vector<1x256xi1>
    %c17_i32_22 = arith.constant 17 : i32
    %78 = vector.broadcast %c17_i32_22 : i32 to vector<1x256xi32>
    %79 = arith.cmpi slt, %3, %78 : vector<1x256xi32>
    %80 = arith.andi %77, %79 : vector<1x256xi1>
    %c1_i32_23 = arith.constant 1 : i32
    %81 = vector.broadcast %c1_i32_23 : i32 to vector<1x256xi32>
    %82 = arith.cmpi sge, %2, %81 : vector<1x256xi32>
    %c17_i32_24 = arith.constant 17 : i32
    %83 = vector.broadcast %c17_i32_24 : i32 to vector<1x256xi32>
    %84 = arith.cmpi slt, %2, %83 : vector<1x256xi32>
    %85 = arith.andi %82, %84 : vector<1x256xi1>
    %c0_i32_25 = arith.constant 0 : i32
    %86 = vector.broadcast %c0_i32_25 : i32 to vector<1x256xi32>
    %87 = arith.cmpi sge, %3, %86 : vector<1x256xi32>
    %88 = arith.andi %85, %87 : vector<1x256xi1>
    %c16_i32_26 = arith.constant 16 : i32
    %89 = vector.broadcast %c16_i32_26 : i32 to vector<1x256xi32>
    %90 = arith.cmpi slt, %3, %89 : vector<1x256xi32>
    %91 = arith.andi %88, %90 : vector<1x256xi1>
    %c1_i32_27 = arith.constant 1 : i32
    %92 = vector.broadcast %c1_i32_27 : i32 to vector<1x256xi32>
    %93 = arith.cmpi sge, %2, %92 : vector<1x256xi32>
    %c17_i32_28 = arith.constant 17 : i32
    %94 = vector.broadcast %c17_i32_28 : i32 to vector<1x256xi32>
    %95 = arith.cmpi slt, %2, %94 : vector<1x256xi32>
    %96 = arith.andi %93, %95 : vector<1x256xi1>
    %c-1_i32_29 = arith.constant -1 : i32
    %97 = vector.broadcast %c-1_i32_29 : i32 to vector<1x256xi32>
    %98 = arith.cmpi sge, %3, %97 : vector<1x256xi32>
    %99 = arith.andi %96, %98 : vector<1x256xi1>
    %c15_i32_30 = arith.constant 15 : i32
    %100 = vector.broadcast %c15_i32_30 : i32 to vector<1x256xi32>
    %101 = arith.cmpi slt, %3, %100 : vector<1x256xi32>
    %102 = arith.andi %99, %101 : vector<1x256xi1>
    %c1_i32_31 = arith.constant 1 : i32
    %103 = vector.broadcast %c1_i32_31 : i32 to vector<1x256xi32>
    %104 = arith.cmpi sge, %2, %103 : vector<1x256xi32>
    %c17_i32_32 = arith.constant 17 : i32
    %105 = vector.broadcast %c17_i32_32 : i32 to vector<1x256xi32>
    %106 = arith.cmpi slt, %2, %105 : vector<1x256xi32>
    %107 = arith.andi %104, %106 : vector<1x256xi1>
    %c-2_i32_33 = arith.constant -2 : i32
    %108 = vector.broadcast %c-2_i32_33 : i32 to vector<1x256xi32>
    %109 = arith.cmpi sge, %3, %108 : vector<1x256xi32>
    %110 = arith.andi %107, %109 : vector<1x256xi1>
    %c14_i32_34 = arith.constant 14 : i32
    %111 = vector.broadcast %c14_i32_34 : i32 to vector<1x256xi32>
    %112 = arith.cmpi slt, %3, %111 : vector<1x256xi32>
    %113 = arith.andi %110, %112 : vector<1x256xi1>
    %c0_i32_35 = arith.constant 0 : i32
    %114 = vector.broadcast %c0_i32_35 : i32 to vector<1x256xi32>
    %115 = arith.cmpi sge, %2, %114 : vector<1x256xi32>
    %c16_i32_36 = arith.constant 16 : i32
    %116 = vector.broadcast %c16_i32_36 : i32 to vector<1x256xi32>
    %117 = arith.cmpi slt, %2, %116 : vector<1x256xi32>
    %118 = arith.andi %115, %117 : vector<1x256xi1>
    %c2_i32_37 = arith.constant 2 : i32
    %119 = vector.broadcast %c2_i32_37 : i32 to vector<1x256xi32>
    %120 = arith.cmpi sge, %3, %119 : vector<1x256xi32>
    %121 = arith.andi %118, %120 : vector<1x256xi1>
    %c18_i32_38 = arith.constant 18 : i32
    %122 = vector.broadcast %c18_i32_38 : i32 to vector<1x256xi32>
    %123 = arith.cmpi slt, %3, %122 : vector<1x256xi32>
    %124 = arith.andi %121, %123 : vector<1x256xi1>
    %c0_i32_39 = arith.constant 0 : i32
    %125 = vector.broadcast %c0_i32_39 : i32 to vector<1x256xi32>
    %126 = arith.cmpi sge, %2, %125 : vector<1x256xi32>
    %c16_i32_40 = arith.constant 16 : i32
    %127 = vector.broadcast %c16_i32_40 : i32 to vector<1x256xi32>
    %128 = arith.cmpi slt, %2, %127 : vector<1x256xi32>
    %129 = arith.andi %126, %128 : vector<1x256xi1>
    %c1_i32_41 = arith.constant 1 : i32
    %130 = vector.broadcast %c1_i32_41 : i32 to vector<1x256xi32>
    %131 = arith.cmpi sge, %3, %130 : vector<1x256xi32>
    %132 = arith.andi %129, %131 : vector<1x256xi1>
    %c17_i32_42 = arith.constant 17 : i32
    %133 = vector.broadcast %c17_i32_42 : i32 to vector<1x256xi32>
    %134 = arith.cmpi slt, %3, %133 : vector<1x256xi32>
    %135 = arith.andi %132, %134 : vector<1x256xi1>
    %c0_i32_43 = arith.constant 0 : i32
    %136 = vector.broadcast %c0_i32_43 : i32 to vector<1x256xi32>
    %137 = arith.cmpi sge, %2, %136 : vector<1x256xi32>
    %c16_i32_44 = arith.constant 16 : i32
    %138 = vector.broadcast %c16_i32_44 : i32 to vector<1x256xi32>
    %139 = arith.cmpi slt, %2, %138 : vector<1x256xi32>
    %140 = arith.andi %137, %139 : vector<1x256xi1>
    %c0_i32_45 = arith.constant 0 : i32
    %141 = vector.broadcast %c0_i32_45 : i32 to vector<1x256xi32>
    %142 = arith.cmpi sge, %3, %141 : vector<1x256xi32>
    %143 = arith.andi %140, %142 : vector<1x256xi1>
    %c16_i32_46 = arith.constant 16 : i32
    %144 = vector.broadcast %c16_i32_46 : i32 to vector<1x256xi32>
    %145 = arith.cmpi slt, %3, %144 : vector<1x256xi32>
    %146 = arith.andi %143, %145 : vector<1x256xi1>
    %c0_i32_47 = arith.constant 0 : i32
    %147 = vector.broadcast %c0_i32_47 : i32 to vector<1x256xi32>
    %148 = arith.cmpi sge, %2, %147 : vector<1x256xi32>
    %c16_i32_48 = arith.constant 16 : i32
    %149 = vector.broadcast %c16_i32_48 : i32 to vector<1x256xi32>
    %150 = arith.cmpi slt, %2, %149 : vector<1x256xi32>
    %151 = arith.andi %148, %150 : vector<1x256xi1>
    %c-1_i32_49 = arith.constant -1 : i32
    %152 = vector.broadcast %c-1_i32_49 : i32 to vector<1x256xi32>
    %153 = arith.cmpi sge, %3, %152 : vector<1x256xi32>
    %154 = arith.andi %151, %153 : vector<1x256xi1>
    %c15_i32_50 = arith.constant 15 : i32
    %155 = vector.broadcast %c15_i32_50 : i32 to vector<1x256xi32>
    %156 = arith.cmpi slt, %3, %155 : vector<1x256xi32>
    %157 = arith.andi %154, %156 : vector<1x256xi1>
    %c0_i32_51 = arith.constant 0 : i32
    %158 = vector.broadcast %c0_i32_51 : i32 to vector<1x256xi32>
    %159 = arith.cmpi sge, %2, %158 : vector<1x256xi32>
    %c16_i32_52 = arith.constant 16 : i32
    %160 = vector.broadcast %c16_i32_52 : i32 to vector<1x256xi32>
    %161 = arith.cmpi slt, %2, %160 : vector<1x256xi32>
    %162 = arith.andi %159, %161 : vector<1x256xi1>
    %c-2_i32_53 = arith.constant -2 : i32
    %163 = vector.broadcast %c-2_i32_53 : i32 to vector<1x256xi32>
    %164 = arith.cmpi sge, %3, %163 : vector<1x256xi32>
    %165 = arith.andi %162, %164 : vector<1x256xi1>
    %c14_i32_54 = arith.constant 14 : i32
    %166 = vector.broadcast %c14_i32_54 : i32 to vector<1x256xi32>
    %167 = arith.cmpi slt, %3, %166 : vector<1x256xi32>
    %168 = arith.andi %165, %167 : vector<1x256xi1>
    %c-1_i32_55 = arith.constant -1 : i32
    %169 = vector.broadcast %c-1_i32_55 : i32 to vector<1x256xi32>
    %170 = arith.cmpi sge, %2, %169 : vector<1x256xi32>
    %c15_i32_56 = arith.constant 15 : i32
    %171 = vector.broadcast %c15_i32_56 : i32 to vector<1x256xi32>
    %172 = arith.cmpi slt, %2, %171 : vector<1x256xi32>
    %173 = arith.andi %170, %172 : vector<1x256xi1>
    %c2_i32_57 = arith.constant 2 : i32
    %174 = vector.broadcast %c2_i32_57 : i32 to vector<1x256xi32>
    %175 = arith.cmpi sge, %3, %174 : vector<1x256xi32>
    %176 = arith.andi %173, %175 : vector<1x256xi1>
    %c18_i32_58 = arith.constant 18 : i32
    %177 = vector.broadcast %c18_i32_58 : i32 to vector<1x256xi32>
    %178 = arith.cmpi slt, %3, %177 : vector<1x256xi32>
    %179 = arith.andi %176, %178 : vector<1x256xi1>
    %c-1_i32_59 = arith.constant -1 : i32
    %180 = vector.broadcast %c-1_i32_59 : i32 to vector<1x256xi32>
    %181 = arith.cmpi sge, %2, %180 : vector<1x256xi32>
    %c15_i32_60 = arith.constant 15 : i32
    %182 = vector.broadcast %c15_i32_60 : i32 to vector<1x256xi32>
    %183 = arith.cmpi slt, %2, %182 : vector<1x256xi32>
    %184 = arith.andi %181, %183 : vector<1x256xi1>
    %c1_i32_61 = arith.constant 1 : i32
    %185 = vector.broadcast %c1_i32_61 : i32 to vector<1x256xi32>
    %186 = arith.cmpi sge, %3, %185 : vector<1x256xi32>
    %187 = arith.andi %184, %186 : vector<1x256xi1>
    %c17_i32_62 = arith.constant 17 : i32
    %188 = vector.broadcast %c17_i32_62 : i32 to vector<1x256xi32>
    %189 = arith.cmpi slt, %3, %188 : vector<1x256xi32>
    %190 = arith.andi %187, %189 : vector<1x256xi1>
    %c-1_i32_63 = arith.constant -1 : i32
    %191 = vector.broadcast %c-1_i32_63 : i32 to vector<1x256xi32>
    %192 = arith.cmpi sge, %2, %191 : vector<1x256xi32>
    %c15_i32_64 = arith.constant 15 : i32
    %193 = vector.broadcast %c15_i32_64 : i32 to vector<1x256xi32>
    %194 = arith.cmpi slt, %2, %193 : vector<1x256xi32>
    %195 = arith.andi %192, %194 : vector<1x256xi1>
    %c0_i32_65 = arith.constant 0 : i32
    %196 = vector.broadcast %c0_i32_65 : i32 to vector<1x256xi32>
    %197 = arith.cmpi sge, %3, %196 : vector<1x256xi32>
    %198 = arith.andi %195, %197 : vector<1x256xi1>
    %c16_i32_66 = arith.constant 16 : i32
    %199 = vector.broadcast %c16_i32_66 : i32 to vector<1x256xi32>
    %200 = arith.cmpi slt, %3, %199 : vector<1x256xi32>
    %201 = arith.andi %198, %200 : vector<1x256xi1>
    %c-1_i32_67 = arith.constant -1 : i32
    %202 = vector.broadcast %c-1_i32_67 : i32 to vector<1x256xi32>
    %203 = arith.cmpi sge, %2, %202 : vector<1x256xi32>
    %c15_i32_68 = arith.constant 15 : i32
    %204 = vector.broadcast %c15_i32_68 : i32 to vector<1x256xi32>
    %205 = arith.cmpi slt, %2, %204 : vector<1x256xi32>
    %206 = arith.andi %203, %205 : vector<1x256xi1>
    %c-1_i32_69 = arith.constant -1 : i32
    %207 = vector.broadcast %c-1_i32_69 : i32 to vector<1x256xi32>
    %208 = arith.cmpi sge, %3, %207 : vector<1x256xi32>
    %209 = arith.andi %206, %208 : vector<1x256xi1>
    %c15_i32_70 = arith.constant 15 : i32
    %210 = vector.broadcast %c15_i32_70 : i32 to vector<1x256xi32>
    %211 = arith.cmpi slt, %3, %210 : vector<1x256xi32>
    %212 = arith.andi %209, %211 : vector<1x256xi1>
    %c-1_i32_71 = arith.constant -1 : i32
    %213 = vector.broadcast %c-1_i32_71 : i32 to vector<1x256xi32>
    %214 = arith.cmpi sge, %2, %213 : vector<1x256xi32>
    %c15_i32_72 = arith.constant 15 : i32
    %215 = vector.broadcast %c15_i32_72 : i32 to vector<1x256xi32>
    %216 = arith.cmpi slt, %2, %215 : vector<1x256xi32>
    %217 = arith.andi %214, %216 : vector<1x256xi1>
    %c-2_i32_73 = arith.constant -2 : i32
    %218 = vector.broadcast %c-2_i32_73 : i32 to vector<1x256xi32>
    %219 = arith.cmpi sge, %3, %218 : vector<1x256xi32>
    %220 = arith.andi %217, %219 : vector<1x256xi1>
    %c14_i32_74 = arith.constant 14 : i32
    %221 = vector.broadcast %c14_i32_74 : i32 to vector<1x256xi32>
    %222 = arith.cmpi slt, %3, %221 : vector<1x256xi32>
    %223 = arith.andi %220, %222 : vector<1x256xi1>
    %c-2_i32_75 = arith.constant -2 : i32
    %224 = vector.broadcast %c-2_i32_75 : i32 to vector<1x256xi32>
    %225 = arith.cmpi sge, %2, %224 : vector<1x256xi32>
    %c14_i32_76 = arith.constant 14 : i32
    %226 = vector.broadcast %c14_i32_76 : i32 to vector<1x256xi32>
    %227 = arith.cmpi slt, %2, %226 : vector<1x256xi32>
    %228 = arith.andi %225, %227 : vector<1x256xi1>
    %c2_i32_77 = arith.constant 2 : i32
    %229 = vector.broadcast %c2_i32_77 : i32 to vector<1x256xi32>
    %230 = arith.cmpi sge, %3, %229 : vector<1x256xi32>
    %231 = arith.andi %228, %230 : vector<1x256xi1>
    %c18_i32_78 = arith.constant 18 : i32
    %232 = vector.broadcast %c18_i32_78 : i32 to vector<1x256xi32>
    %233 = arith.cmpi slt, %3, %232 : vector<1x256xi32>
    %234 = arith.andi %231, %233 : vector<1x256xi1>
    %c-2_i32_79 = arith.constant -2 : i32
    %235 = vector.broadcast %c-2_i32_79 : i32 to vector<1x256xi32>
    %236 = arith.cmpi sge, %2, %235 : vector<1x256xi32>
    %c14_i32_80 = arith.constant 14 : i32
    %237 = vector.broadcast %c14_i32_80 : i32 to vector<1x256xi32>
    %238 = arith.cmpi slt, %2, %237 : vector<1x256xi32>
    %239 = arith.andi %236, %238 : vector<1x256xi1>
    %c1_i32_81 = arith.constant 1 : i32
    %240 = vector.broadcast %c1_i32_81 : i32 to vector<1x256xi32>
    %241 = arith.cmpi sge, %3, %240 : vector<1x256xi32>
    %242 = arith.andi %239, %241 : vector<1x256xi1>
    %c17_i32_82 = arith.constant 17 : i32
    %243 = vector.broadcast %c17_i32_82 : i32 to vector<1x256xi32>
    %244 = arith.cmpi slt, %3, %243 : vector<1x256xi32>
    %245 = arith.andi %242, %244 : vector<1x256xi1>
    %c-2_i32_83 = arith.constant -2 : i32
    %246 = vector.broadcast %c-2_i32_83 : i32 to vector<1x256xi32>
    %247 = arith.cmpi sge, %2, %246 : vector<1x256xi32>
    %c14_i32_84 = arith.constant 14 : i32
    %248 = vector.broadcast %c14_i32_84 : i32 to vector<1x256xi32>
    %249 = arith.cmpi slt, %2, %248 : vector<1x256xi32>
    %250 = arith.andi %247, %249 : vector<1x256xi1>
    %c0_i32_85 = arith.constant 0 : i32
    %251 = vector.broadcast %c0_i32_85 : i32 to vector<1x256xi32>
    %252 = arith.cmpi sge, %3, %251 : vector<1x256xi32>
    %253 = arith.andi %250, %252 : vector<1x256xi1>
    %c16_i32_86 = arith.constant 16 : i32
    %254 = vector.broadcast %c16_i32_86 : i32 to vector<1x256xi32>
    %255 = arith.cmpi slt, %3, %254 : vector<1x256xi32>
    %256 = arith.andi %253, %255 : vector<1x256xi1>
    %c-2_i32_87 = arith.constant -2 : i32
    %257 = vector.broadcast %c-2_i32_87 : i32 to vector<1x256xi32>
    %258 = arith.cmpi sge, %2, %257 : vector<1x256xi32>
    %c14_i32_88 = arith.constant 14 : i32
    %259 = vector.broadcast %c14_i32_88 : i32 to vector<1x256xi32>
    %260 = arith.cmpi slt, %2, %259 : vector<1x256xi32>
    %261 = arith.andi %258, %260 : vector<1x256xi1>
    %c-1_i32_89 = arith.constant -1 : i32
    %262 = vector.broadcast %c-1_i32_89 : i32 to vector<1x256xi32>
    %263 = arith.cmpi sge, %3, %262 : vector<1x256xi32>
    %264 = arith.andi %261, %263 : vector<1x256xi1>
    %c15_i32_90 = arith.constant 15 : i32
    %265 = vector.broadcast %c15_i32_90 : i32 to vector<1x256xi32>
    %266 = arith.cmpi slt, %3, %265 : vector<1x256xi32>
    %267 = arith.andi %264, %266 : vector<1x256xi1>
    %c-2_i32_91 = arith.constant -2 : i32
    %268 = vector.broadcast %c-2_i32_91 : i32 to vector<1x256xi32>
    %269 = arith.cmpi sge, %2, %268 : vector<1x256xi32>
    %c14_i32_92 = arith.constant 14 : i32
    %270 = vector.broadcast %c14_i32_92 : i32 to vector<1x256xi32>
    %271 = arith.cmpi slt, %2, %270 : vector<1x256xi32>
    %272 = arith.andi %269, %271 : vector<1x256xi1>
    %c-2_i32_93 = arith.constant -2 : i32
    %273 = vector.broadcast %c-2_i32_93 : i32 to vector<1x256xi32>
    %274 = arith.cmpi sge, %3, %273 : vector<1x256xi32>
    %275 = arith.andi %272, %274 : vector<1x256xi1>
    %c14_i32_94 = arith.constant 14 : i32
    %276 = vector.broadcast %c14_i32_94 : i32 to vector<1x256xi32>
    %277 = arith.cmpi slt, %3, %276 : vector<1x256xi32>
    %278 = arith.andi %275, %277 : vector<1x256xi1>
    %c0_95 = arith.constant 0 : index
    %c0_96 = arith.constant 0 : index
    %279 = vector.load %arg3[%c0_95, %c0_96] : memref<16x4xf32, #tpu.memory_space<vmem>>, vector<16x4xf32>
    %cst = arith.constant dense<0.000000e+00> : vector<16x256xf32>
    %280 = tpu.matmul %279, %1, %cst {dimension_numbers = #tpu.dot_dimension_numbers<[1], [0], [0], [1], [0, 0, 1, 1], [], []>} : vector<16x4xf32>, vector<4x256xf32>, vector<16x256xf32> -> vector<16x256xf32>
    %c0_97 = arith.constant 0 : index
    %c0_98 = arith.constant 0 : index
    %281 = vector.load %arg4[%c0_97, %c0_98] : memref<16x1xf32, #tpu.memory_space<vmem>>, vector<16x1xf32>
    %282 = vector.broadcast %281 : vector<16x1xf32> to vector<16x256xf32>
    %283 = arith.addf %280, %282 : vector<16x256xf32>
    %284 = vector.extract_strided_slice %283 {offsets = [0, 0], sizes = [8, 256], strides = [1, 1]} : vector<16x256xf32> to vector<8x256xf32>
    %cst_99 = arith.constant 0.000000e+00 : f32
    %285 = vector.broadcast %cst_99 : f32 to vector<8x256xf32>
    %286 = arith.maximumf %284, %285 : vector<8x256xf32>
    %287 = vector.extract_strided_slice %283 {offsets = [8, 0], sizes = [4, 256], strides = [1, 1]} : vector<16x256xf32> to vector<4x256xf32>
    %288 = vector.extract_strided_slice %283 {offsets = [12, 0], sizes = [4, 256], strides = [1, 1]} : vector<16x256xf32> to vector<4x256xf32>
    %289 = vector.extract_strided_slice %287 {offsets = [0, 239], sizes = [4, 17], strides = [1, 1]} : vector<4x256xf32> to vector<4x17xf32>
    %290 = vector.extract_strided_slice %287 {offsets = [0, 0], sizes = [4, 239], strides = [1, 1]} : vector<4x256xf32> to vector<4x239xf32>
    %291 = tpu.concatenate %289, %290 in 1 : vector<4x17xf32>, vector<4x239xf32> -> vector<4x256xf32>
    %cst_100 = arith.constant 0.000000e+00 : f32
    %292 = vector.shape_cast %80 : vector<1x256xi1> to vector<1x256xi1>
    %293 = vector.broadcast %292 : vector<1x256xi1> to vector<4x256xi1>
    %294 = vector.broadcast %cst_100 : f32 to vector<4x256xf32>
    %295 = arith.select %293, %291, %294 : vector<4x256xi1>, vector<4x256xf32>
    %296 = vector.extract_strided_slice %287 {offsets = [0, 240], sizes = [4, 16], strides = [1, 1]} : vector<4x256xf32> to vector<4x16xf32>
    %297 = vector.extract_strided_slice %287 {offsets = [0, 0], sizes = [4, 240], strides = [1, 1]} : vector<4x256xf32> to vector<4x240xf32>
    %298 = tpu.concatenate %296, %297 in 1 : vector<4x16xf32>, vector<4x240xf32> -> vector<4x256xf32>
    %cst_101 = arith.constant 0.000000e+00 : f32
    %299 = vector.shape_cast %91 : vector<1x256xi1> to vector<1x256xi1>
    %300 = vector.broadcast %299 : vector<1x256xi1> to vector<4x256xi1>
    %301 = vector.broadcast %cst_101 : f32 to vector<4x256xf32>
    %302 = arith.select %300, %298, %301 : vector<4x256xi1>, vector<4x256xf32>
    %303 = vector.extract_strided_slice %287 {offsets = [0, 241], sizes = [4, 15], strides = [1, 1]} : vector<4x256xf32> to vector<4x15xf32>
    %304 = vector.extract_strided_slice %287 {offsets = [0, 0], sizes = [4, 241], strides = [1, 1]} : vector<4x256xf32> to vector<4x241xf32>
    %305 = tpu.concatenate %303, %304 in 1 : vector<4x15xf32>, vector<4x241xf32> -> vector<4x256xf32>
    %cst_102 = arith.constant 0.000000e+00 : f32
    %306 = vector.shape_cast %102 : vector<1x256xi1> to vector<1x256xi1>
    %307 = vector.broadcast %306 : vector<1x256xi1> to vector<4x256xi1>
    %308 = vector.broadcast %cst_102 : f32 to vector<4x256xf32>
    %309 = arith.select %307, %305, %308 : vector<4x256xi1>, vector<4x256xf32>
    %310 = vector.extract_strided_slice %287 {offsets = [0, 255], sizes = [4, 1], strides = [1, 1]} : vector<4x256xf32> to vector<4x1xf32>
    %311 = vector.extract_strided_slice %287 {offsets = [0, 0], sizes = [4, 255], strides = [1, 1]} : vector<4x256xf32> to vector<4x255xf32>
    %312 = tpu.concatenate %310, %311 in 1 : vector<4x1xf32>, vector<4x255xf32> -> vector<4x256xf32>
    %cst_103 = arith.constant 0.000000e+00 : f32
    %313 = vector.shape_cast %135 : vector<1x256xi1> to vector<1x256xi1>
    %314 = vector.broadcast %313 : vector<1x256xi1> to vector<4x256xi1>
    %315 = vector.broadcast %cst_103 : f32 to vector<4x256xf32>
    %316 = arith.select %314, %312, %315 : vector<4x256xi1>, vector<4x256xf32>
    %cst_104 = arith.constant 0.000000e+00 : f32
    %317 = vector.shape_cast %146 : vector<1x256xi1> to vector<1x256xi1>
    %318 = vector.broadcast %317 : vector<1x256xi1> to vector<4x256xi1>
    %319 = vector.broadcast %cst_104 : f32 to vector<4x256xf32>
    %320 = arith.select %318, %287, %319 : vector<4x256xi1>, vector<4x256xf32>
    %321 = vector.extract_strided_slice %287 {offsets = [0, 1], sizes = [4, 255], strides = [1, 1]} : vector<4x256xf32> to vector<4x255xf32>
    %322 = vector.extract_strided_slice %287 {offsets = [0, 0], sizes = [4, 1], strides = [1, 1]} : vector<4x256xf32> to vector<4x1xf32>
    %323 = tpu.concatenate %321, %322 in 1 : vector<4x255xf32>, vector<4x1xf32> -> vector<4x256xf32>
    %cst_105 = arith.constant 0.000000e+00 : f32
    %324 = vector.shape_cast %157 : vector<1x256xi1> to vector<1x256xi1>
    %325 = vector.broadcast %324 : vector<1x256xi1> to vector<4x256xi1>
    %326 = vector.broadcast %cst_105 : f32 to vector<4x256xf32>
    %327 = arith.select %325, %323, %326 : vector<4x256xi1>, vector<4x256xf32>
    %328 = vector.extract_strided_slice %287 {offsets = [0, 15], sizes = [4, 241], strides = [1, 1]} : vector<4x256xf32> to vector<4x241xf32>
    %329 = vector.extract_strided_slice %287 {offsets = [0, 0], sizes = [4, 15], strides = [1, 1]} : vector<4x256xf32> to vector<4x15xf32>
    %330 = tpu.concatenate %328, %329 in 1 : vector<4x241xf32>, vector<4x15xf32> -> vector<4x256xf32>
    %cst_106 = arith.constant 0.000000e+00 : f32
    %331 = vector.shape_cast %190 : vector<1x256xi1> to vector<1x256xi1>
    %332 = vector.broadcast %331 : vector<1x256xi1> to vector<4x256xi1>
    %333 = vector.broadcast %cst_106 : f32 to vector<4x256xf32>
    %334 = arith.select %332, %330, %333 : vector<4x256xi1>, vector<4x256xf32>
    %335 = vector.extract_strided_slice %287 {offsets = [0, 16], sizes = [4, 240], strides = [1, 1]} : vector<4x256xf32> to vector<4x240xf32>
    %336 = vector.extract_strided_slice %287 {offsets = [0, 0], sizes = [4, 16], strides = [1, 1]} : vector<4x256xf32> to vector<4x16xf32>
    %337 = tpu.concatenate %335, %336 in 1 : vector<4x240xf32>, vector<4x16xf32> -> vector<4x256xf32>
    %cst_107 = arith.constant 0.000000e+00 : f32
    %338 = vector.shape_cast %201 : vector<1x256xi1> to vector<1x256xi1>
    %339 = vector.broadcast %338 : vector<1x256xi1> to vector<4x256xi1>
    %340 = vector.broadcast %cst_107 : f32 to vector<4x256xf32>
    %341 = arith.select %339, %337, %340 : vector<4x256xi1>, vector<4x256xf32>
    %342 = vector.extract_strided_slice %287 {offsets = [0, 17], sizes = [4, 239], strides = [1, 1]} : vector<4x256xf32> to vector<4x239xf32>
    %343 = vector.extract_strided_slice %287 {offsets = [0, 0], sizes = [4, 17], strides = [1, 1]} : vector<4x256xf32> to vector<4x17xf32>
    %344 = tpu.concatenate %342, %343 in 1 : vector<4x239xf32>, vector<4x17xf32> -> vector<4x256xf32>
    %cst_108 = arith.constant 0.000000e+00 : f32
    %345 = vector.shape_cast %212 : vector<1x256xi1> to vector<1x256xi1>
    %346 = vector.broadcast %345 : vector<1x256xi1> to vector<4x256xi1>
    %347 = vector.broadcast %cst_108 : f32 to vector<4x256xf32>
    %348 = arith.select %346, %344, %347 : vector<4x256xi1>, vector<4x256xf32>
    %349 = tpu.concatenate %295, %302, %309, %316, %320, %327, %334, %341, %348 in 0 : vector<4x256xf32>, vector<4x256xf32>, vector<4x256xf32>, vector<4x256xf32>, vector<4x256xf32>, vector<4x256xf32>, vector<4x256xf32>, vector<4x256xf32>, vector<4x256xf32> -> vector<36x256xf32>
    %c0_109 = arith.constant 0 : index
    %c0_110 = arith.constant 0 : index
    %350 = vector.load %arg5[%c0_109, %c0_110] : memref<8x36xf32, #tpu.memory_space<vmem>>, vector<8x36xf32>
    %cst_111 = arith.constant dense<0.000000e+00> : vector<8x256xf32>
    %351 = tpu.matmul %350, %349, %cst_111 {dimension_numbers = #tpu.dot_dimension_numbers<[1], [0], [0], [1], [0, 0, 1, 1], [], []>} : vector<8x36xf32>, vector<36x256xf32>, vector<8x256xf32> -> vector<8x256xf32>
    %c0_112 = arith.constant 0 : index
    %c0_113 = arith.constant 0 : index
    %352 = vector.load %arg6[%c0_112, %c0_113] : memref<8x1xf32, #tpu.memory_space<vmem>>, vector<8x1xf32>
    %353 = vector.broadcast %352 : vector<8x1xf32> to vector<8x256xf32>
    %354 = arith.addf %351, %353 : vector<8x256xf32>
    %cst_114 = arith.constant 0.000000e+00 : f32
    %355 = vector.broadcast %cst_114 : f32 to vector<8x256xf32>
    %356 = arith.maximumf %354, %355 : vector<8x256xf32>
    %357 = vector.extract_strided_slice %288 {offsets = [0, 222], sizes = [4, 34], strides = [1, 1]} : vector<4x256xf32> to vector<4x34xf32>
    %358 = vector.extract_strided_slice %288 {offsets = [0, 0], sizes = [4, 222], strides = [1, 1]} : vector<4x256xf32> to vector<4x222xf32>
    %359 = tpu.concatenate %357, %358 in 1 : vector<4x34xf32>, vector<4x222xf32> -> vector<4x256xf32>
    %cst_115 = arith.constant 0.000000e+00 : f32
    %360 = vector.shape_cast %14 : vector<1x256xi1> to vector<1x256xi1>
    %361 = vector.broadcast %360 : vector<1x256xi1> to vector<4x256xi1>
    %362 = vector.broadcast %cst_115 : f32 to vector<4x256xf32>
    %363 = arith.select %361, %359, %362 : vector<4x256xi1>, vector<4x256xf32>
    %364 = vector.extract_strided_slice %288 {offsets = [0, 223], sizes = [4, 33], strides = [1, 1]} : vector<4x256xf32> to vector<4x33xf32>
    %365 = vector.extract_strided_slice %288 {offsets = [0, 0], sizes = [4, 223], strides = [1, 1]} : vector<4x256xf32> to vector<4x223xf32>
    %366 = tpu.concatenate %364, %365 in 1 : vector<4x33xf32>, vector<4x223xf32> -> vector<4x256xf32>
    %cst_116 = arith.constant 0.000000e+00 : f32
    %367 = vector.shape_cast %25 : vector<1x256xi1> to vector<1x256xi1>
    %368 = vector.broadcast %367 : vector<1x256xi1> to vector<4x256xi1>
    %369 = vector.broadcast %cst_116 : f32 to vector<4x256xf32>
    %370 = arith.select %368, %366, %369 : vector<4x256xi1>, vector<4x256xf32>
    %371 = vector.extract_strided_slice %288 {offsets = [0, 224], sizes = [4, 32], strides = [1, 1]} : vector<4x256xf32> to vector<4x32xf32>
    %372 = vector.extract_strided_slice %288 {offsets = [0, 0], sizes = [4, 224], strides = [1, 1]} : vector<4x256xf32> to vector<4x224xf32>
    %373 = tpu.concatenate %371, %372 in 1 : vector<4x32xf32>, vector<4x224xf32> -> vector<4x256xf32>
    %cst_117 = arith.constant 0.000000e+00 : f32
    %374 = vector.shape_cast %36 : vector<1x256xi1> to vector<1x256xi1>
    %375 = vector.broadcast %374 : vector<1x256xi1> to vector<4x256xi1>
    %376 = vector.broadcast %cst_117 : f32 to vector<4x256xf32>
    %377 = arith.select %375, %373, %376 : vector<4x256xi1>, vector<4x256xf32>
    %378 = vector.extract_strided_slice %288 {offsets = [0, 225], sizes = [4, 31], strides = [1, 1]} : vector<4x256xf32> to vector<4x31xf32>
    %379 = vector.extract_strided_slice %288 {offsets = [0, 0], sizes = [4, 225], strides = [1, 1]} : vector<4x256xf32> to vector<4x225xf32>
    %380 = tpu.concatenate %378, %379 in 1 : vector<4x31xf32>, vector<4x225xf32> -> vector<4x256xf32>
    %cst_118 = arith.constant 0.000000e+00 : f32
    %381 = vector.shape_cast %47 : vector<1x256xi1> to vector<1x256xi1>
    %382 = vector.broadcast %381 : vector<1x256xi1> to vector<4x256xi1>
    %383 = vector.broadcast %cst_118 : f32 to vector<4x256xf32>
    %384 = arith.select %382, %380, %383 : vector<4x256xi1>, vector<4x256xf32>
    %385 = vector.extract_strided_slice %288 {offsets = [0, 226], sizes = [4, 30], strides = [1, 1]} : vector<4x256xf32> to vector<4x30xf32>
    %386 = vector.extract_strided_slice %288 {offsets = [0, 0], sizes = [4, 226], strides = [1, 1]} : vector<4x256xf32> to vector<4x226xf32>
    %387 = tpu.concatenate %385, %386 in 1 : vector<4x30xf32>, vector<4x226xf32> -> vector<4x256xf32>
    %cst_119 = arith.constant 0.000000e+00 : f32
    %388 = vector.shape_cast %58 : vector<1x256xi1> to vector<1x256xi1>
    %389 = vector.broadcast %388 : vector<1x256xi1> to vector<4x256xi1>
    %390 = vector.broadcast %cst_119 : f32 to vector<4x256xf32>
    %391 = arith.select %389, %387, %390 : vector<4x256xi1>, vector<4x256xf32>
    %392 = vector.extract_strided_slice %288 {offsets = [0, 238], sizes = [4, 18], strides = [1, 1]} : vector<4x256xf32> to vector<4x18xf32>
    %393 = vector.extract_strided_slice %288 {offsets = [0, 0], sizes = [4, 238], strides = [1, 1]} : vector<4x256xf32> to vector<4x238xf32>
    %394 = tpu.concatenate %392, %393 in 1 : vector<4x18xf32>, vector<4x238xf32> -> vector<4x256xf32>
    %cst_120 = arith.constant 0.000000e+00 : f32
    %395 = vector.shape_cast %69 : vector<1x256xi1> to vector<1x256xi1>
    %396 = vector.broadcast %395 : vector<1x256xi1> to vector<4x256xi1>
    %397 = vector.broadcast %cst_120 : f32 to vector<4x256xf32>
    %398 = arith.select %396, %394, %397 : vector<4x256xi1>, vector<4x256xf32>
    %399 = vector.extract_strided_slice %288 {offsets = [0, 239], sizes = [4, 17], strides = [1, 1]} : vector<4x256xf32> to vector<4x17xf32>
    %400 = vector.extract_strided_slice %288 {offsets = [0, 0], sizes = [4, 239], strides = [1, 1]} : vector<4x256xf32> to vector<4x239xf32>
    %401 = tpu.concatenate %399, %400 in 1 : vector<4x17xf32>, vector<4x239xf32> -> vector<4x256xf32>
    %cst_121 = arith.constant 0.000000e+00 : f32
    %402 = vector.shape_cast %80 : vector<1x256xi1> to vector<1x256xi1>
    %403 = vector.broadcast %402 : vector<1x256xi1> to vector<4x256xi1>
    %404 = vector.broadcast %cst_121 : f32 to vector<4x256xf32>
    %405 = arith.select %403, %401, %404 : vector<4x256xi1>, vector<4x256xf32>
    %406 = vector.extract_strided_slice %288 {offsets = [0, 240], sizes = [4, 16], strides = [1, 1]} : vector<4x256xf32> to vector<4x16xf32>
    %407 = vector.extract_strided_slice %288 {offsets = [0, 0], sizes = [4, 240], strides = [1, 1]} : vector<4x256xf32> to vector<4x240xf32>
    %408 = tpu.concatenate %406, %407 in 1 : vector<4x16xf32>, vector<4x240xf32> -> vector<4x256xf32>
    %cst_122 = arith.constant 0.000000e+00 : f32
    %409 = vector.shape_cast %91 : vector<1x256xi1> to vector<1x256xi1>
    %410 = vector.broadcast %409 : vector<1x256xi1> to vector<4x256xi1>
    %411 = vector.broadcast %cst_122 : f32 to vector<4x256xf32>
    %412 = arith.select %410, %408, %411 : vector<4x256xi1>, vector<4x256xf32>
    %413 = vector.extract_strided_slice %288 {offsets = [0, 241], sizes = [4, 15], strides = [1, 1]} : vector<4x256xf32> to vector<4x15xf32>
    %414 = vector.extract_strided_slice %288 {offsets = [0, 0], sizes = [4, 241], strides = [1, 1]} : vector<4x256xf32> to vector<4x241xf32>
    %415 = tpu.concatenate %413, %414 in 1 : vector<4x15xf32>, vector<4x241xf32> -> vector<4x256xf32>
    %cst_123 = arith.constant 0.000000e+00 : f32
    %416 = vector.shape_cast %102 : vector<1x256xi1> to vector<1x256xi1>
    %417 = vector.broadcast %416 : vector<1x256xi1> to vector<4x256xi1>
    %418 = vector.broadcast %cst_123 : f32 to vector<4x256xf32>
    %419 = arith.select %417, %415, %418 : vector<4x256xi1>, vector<4x256xf32>
    %420 = vector.extract_strided_slice %288 {offsets = [0, 242], sizes = [4, 14], strides = [1, 1]} : vector<4x256xf32> to vector<4x14xf32>
    %421 = vector.extract_strided_slice %288 {offsets = [0, 0], sizes = [4, 242], strides = [1, 1]} : vector<4x256xf32> to vector<4x242xf32>
    %422 = tpu.concatenate %420, %421 in 1 : vector<4x14xf32>, vector<4x242xf32> -> vector<4x256xf32>
    %cst_124 = arith.constant 0.000000e+00 : f32
    %423 = vector.shape_cast %113 : vector<1x256xi1> to vector<1x256xi1>
    %424 = vector.broadcast %423 : vector<1x256xi1> to vector<4x256xi1>
    %425 = vector.broadcast %cst_124 : f32 to vector<4x256xf32>
    %426 = arith.select %424, %422, %425 : vector<4x256xi1>, vector<4x256xf32>
    %427 = vector.extract_strided_slice %288 {offsets = [0, 254], sizes = [4, 2], strides = [1, 1]} : vector<4x256xf32> to vector<4x2xf32>
    %428 = vector.extract_strided_slice %288 {offsets = [0, 0], sizes = [4, 254], strides = [1, 1]} : vector<4x256xf32> to vector<4x254xf32>
    %429 = tpu.concatenate %427, %428 in 1 : vector<4x2xf32>, vector<4x254xf32> -> vector<4x256xf32>
    %cst_125 = arith.constant 0.000000e+00 : f32
    %430 = vector.shape_cast %124 : vector<1x256xi1> to vector<1x256xi1>
    %431 = vector.broadcast %430 : vector<1x256xi1> to vector<4x256xi1>
    %432 = vector.broadcast %cst_125 : f32 to vector<4x256xf32>
    %433 = arith.select %431, %429, %432 : vector<4x256xi1>, vector<4x256xf32>
    %434 = vector.extract_strided_slice %288 {offsets = [0, 255], sizes = [4, 1], strides = [1, 1]} : vector<4x256xf32> to vector<4x1xf32>
    %435 = vector.extract_strided_slice %288 {offsets = [0, 0], sizes = [4, 255], strides = [1, 1]} : vector<4x256xf32> to vector<4x255xf32>
    %436 = tpu.concatenate %434, %435 in 1 : vector<4x1xf32>, vector<4x255xf32> -> vector<4x256xf32>
    %cst_126 = arith.constant 0.000000e+00 : f32
    %437 = vector.shape_cast %135 : vector<1x256xi1> to vector<1x256xi1>
    %438 = vector.broadcast %437 : vector<1x256xi1> to vector<4x256xi1>
    %439 = vector.broadcast %cst_126 : f32 to vector<4x256xf32>
    %440 = arith.select %438, %436, %439 : vector<4x256xi1>, vector<4x256xf32>
    %cst_127 = arith.constant 0.000000e+00 : f32
    %441 = vector.shape_cast %146 : vector<1x256xi1> to vector<1x256xi1>
    %442 = vector.broadcast %441 : vector<1x256xi1> to vector<4x256xi1>
    %443 = vector.broadcast %cst_127 : f32 to vector<4x256xf32>
    %444 = arith.select %442, %288, %443 : vector<4x256xi1>, vector<4x256xf32>
    %445 = vector.extract_strided_slice %288 {offsets = [0, 1], sizes = [4, 255], strides = [1, 1]} : vector<4x256xf32> to vector<4x255xf32>
    %446 = vector.extract_strided_slice %288 {offsets = [0, 0], sizes = [4, 1], strides = [1, 1]} : vector<4x256xf32> to vector<4x1xf32>
    %447 = tpu.concatenate %445, %446 in 1 : vector<4x255xf32>, vector<4x1xf32> -> vector<4x256xf32>
    %cst_128 = arith.constant 0.000000e+00 : f32
    %448 = vector.shape_cast %157 : vector<1x256xi1> to vector<1x256xi1>
    %449 = vector.broadcast %448 : vector<1x256xi1> to vector<4x256xi1>
    %450 = vector.broadcast %cst_128 : f32 to vector<4x256xf32>
    %451 = arith.select %449, %447, %450 : vector<4x256xi1>, vector<4x256xf32>
    %452 = vector.extract_strided_slice %288 {offsets = [0, 2], sizes = [4, 254], strides = [1, 1]} : vector<4x256xf32> to vector<4x254xf32>
    %453 = vector.extract_strided_slice %288 {offsets = [0, 0], sizes = [4, 2], strides = [1, 1]} : vector<4x256xf32> to vector<4x2xf32>
    %454 = tpu.concatenate %452, %453 in 1 : vector<4x254xf32>, vector<4x2xf32> -> vector<4x256xf32>
    %cst_129 = arith.constant 0.000000e+00 : f32
    %455 = vector.shape_cast %168 : vector<1x256xi1> to vector<1x256xi1>
    %456 = vector.broadcast %455 : vector<1x256xi1> to vector<4x256xi1>
    %457 = vector.broadcast %cst_129 : f32 to vector<4x256xf32>
    %458 = arith.select %456, %454, %457 : vector<4x256xi1>, vector<4x256xf32>
    %459 = vector.extract_strided_slice %288 {offsets = [0, 14], sizes = [4, 242], strides = [1, 1]} : vector<4x256xf32> to vector<4x242xf32>
    %460 = vector.extract_strided_slice %288 {offsets = [0, 0], sizes = [4, 14], strides = [1, 1]} : vector<4x256xf32> to vector<4x14xf32>
    %461 = tpu.concatenate %459, %460 in 1 : vector<4x242xf32>, vector<4x14xf32> -> vector<4x256xf32>
    %cst_130 = arith.constant 0.000000e+00 : f32
    %462 = vector.shape_cast %179 : vector<1x256xi1> to vector<1x256xi1>
    %463 = vector.broadcast %462 : vector<1x256xi1> to vector<4x256xi1>
    %464 = vector.broadcast %cst_130 : f32 to vector<4x256xf32>
    %465 = arith.select %463, %461, %464 : vector<4x256xi1>, vector<4x256xf32>
    %466 = vector.extract_strided_slice %288 {offsets = [0, 15], sizes = [4, 241], strides = [1, 1]} : vector<4x256xf32> to vector<4x241xf32>
    %467 = vector.extract_strided_slice %288 {offsets = [0, 0], sizes = [4, 15], strides = [1, 1]} : vector<4x256xf32> to vector<4x15xf32>
    %468 = tpu.concatenate %466, %467 in 1 : vector<4x241xf32>, vector<4x15xf32> -> vector<4x256xf32>
    %cst_131 = arith.constant 0.000000e+00 : f32
    %469 = vector.shape_cast %190 : vector<1x256xi1> to vector<1x256xi1>
    %470 = vector.broadcast %469 : vector<1x256xi1> to vector<4x256xi1>
    %471 = vector.broadcast %cst_131 : f32 to vector<4x256xf32>
    %472 = arith.select %470, %468, %471 : vector<4x256xi1>, vector<4x256xf32>
    %473 = vector.extract_strided_slice %288 {offsets = [0, 16], sizes = [4, 240], strides = [1, 1]} : vector<4x256xf32> to vector<4x240xf32>
    %474 = vector.extract_strided_slice %288 {offsets = [0, 0], sizes = [4, 16], strides = [1, 1]} : vector<4x256xf32> to vector<4x16xf32>
    %475 = tpu.concatenate %473, %474 in 1 : vector<4x240xf32>, vector<4x16xf32> -> vector<4x256xf32>
    %cst_132 = arith.constant 0.000000e+00 : f32
    %476 = vector.shape_cast %201 : vector<1x256xi1> to vector<1x256xi1>
    %477 = vector.broadcast %476 : vector<1x256xi1> to vector<4x256xi1>
    %478 = vector.broadcast %cst_132 : f32 to vector<4x256xf32>
    %479 = arith.select %477, %475, %478 : vector<4x256xi1>, vector<4x256xf32>
    %480 = vector.extract_strided_slice %288 {offsets = [0, 17], sizes = [4, 239], strides = [1, 1]} : vector<4x256xf32> to vector<4x239xf32>
    %481 = vector.extract_strided_slice %288 {offsets = [0, 0], sizes = [4, 17], strides = [1, 1]} : vector<4x256xf32> to vector<4x17xf32>
    %482 = tpu.concatenate %480, %481 in 1 : vector<4x239xf32>, vector<4x17xf32> -> vector<4x256xf32>
    %cst_133 = arith.constant 0.000000e+00 : f32
    %483 = vector.shape_cast %212 : vector<1x256xi1> to vector<1x256xi1>
    %484 = vector.broadcast %483 : vector<1x256xi1> to vector<4x256xi1>
    %485 = vector.broadcast %cst_133 : f32 to vector<4x256xf32>
    %486 = arith.select %484, %482, %485 : vector<4x256xi1>, vector<4x256xf32>
    %487 = vector.extract_strided_slice %288 {offsets = [0, 18], sizes = [4, 238], strides = [1, 1]} : vector<4x256xf32> to vector<4x238xf32>
    %488 = vector.extract_strided_slice %288 {offsets = [0, 0], sizes = [4, 18], strides = [1, 1]} : vector<4x256xf32> to vector<4x18xf32>
    %489 = tpu.concatenate %487, %488 in 1 : vector<4x238xf32>, vector<4x18xf32> -> vector<4x256xf32>
    %cst_134 = arith.constant 0.000000e+00 : f32
    %490 = vector.shape_cast %223 : vector<1x256xi1> to vector<1x256xi1>
    %491 = vector.broadcast %490 : vector<1x256xi1> to vector<4x256xi1>
    %492 = vector.broadcast %cst_134 : f32 to vector<4x256xf32>
    %493 = arith.select %491, %489, %492 : vector<4x256xi1>, vector<4x256xf32>
    %494 = vector.extract_strided_slice %288 {offsets = [0, 30], sizes = [4, 226], strides = [1, 1]} : vector<4x256xf32> to vector<4x226xf32>
    %495 = vector.extract_strided_slice %288 {offsets = [0, 0], sizes = [4, 30], strides = [1, 1]} : vector<4x256xf32> to vector<4x30xf32>
    %496 = tpu.concatenate %494, %495 in 1 : vector<4x226xf32>, vector<4x30xf32> -> vector<4x256xf32>
    %cst_135 = arith.constant 0.000000e+00 : f32
    %497 = vector.shape_cast %234 : vector<1x256xi1> to vector<1x256xi1>
    %498 = vector.broadcast %497 : vector<1x256xi1> to vector<4x256xi1>
    %499 = vector.broadcast %cst_135 : f32 to vector<4x256xf32>
    %500 = arith.select %498, %496, %499 : vector<4x256xi1>, vector<4x256xf32>
    %501 = vector.extract_strided_slice %288 {offsets = [0, 31], sizes = [4, 225], strides = [1, 1]} : vector<4x256xf32> to vector<4x225xf32>
    %502 = vector.extract_strided_slice %288 {offsets = [0, 0], sizes = [4, 31], strides = [1, 1]} : vector<4x256xf32> to vector<4x31xf32>
    %503 = tpu.concatenate %501, %502 in 1 : vector<4x225xf32>, vector<4x31xf32> -> vector<4x256xf32>
    %cst_136 = arith.constant 0.000000e+00 : f32
    %504 = vector.shape_cast %245 : vector<1x256xi1> to vector<1x256xi1>
    %505 = vector.broadcast %504 : vector<1x256xi1> to vector<4x256xi1>
    %506 = vector.broadcast %cst_136 : f32 to vector<4x256xf32>
    %507 = arith.select %505, %503, %506 : vector<4x256xi1>, vector<4x256xf32>
    %508 = vector.extract_strided_slice %288 {offsets = [0, 32], sizes = [4, 224], strides = [1, 1]} : vector<4x256xf32> to vector<4x224xf32>
    %509 = vector.extract_strided_slice %288 {offsets = [0, 0], sizes = [4, 32], strides = [1, 1]} : vector<4x256xf32> to vector<4x32xf32>
    %510 = tpu.concatenate %508, %509 in 1 : vector<4x224xf32>, vector<4x32xf32> -> vector<4x256xf32>
    %cst_137 = arith.constant 0.000000e+00 : f32
    %511 = vector.shape_cast %256 : vector<1x256xi1> to vector<1x256xi1>
    %512 = vector.broadcast %511 : vector<1x256xi1> to vector<4x256xi1>
    %513 = vector.broadcast %cst_137 : f32 to vector<4x256xf32>
    %514 = arith.select %512, %510, %513 : vector<4x256xi1>, vector<4x256xf32>
    %515 = vector.extract_strided_slice %288 {offsets = [0, 33], sizes = [4, 223], strides = [1, 1]} : vector<4x256xf32> to vector<4x223xf32>
    %516 = vector.extract_strided_slice %288 {offsets = [0, 0], sizes = [4, 33], strides = [1, 1]} : vector<4x256xf32> to vector<4x33xf32>
    %517 = tpu.concatenate %515, %516 in 1 : vector<4x223xf32>, vector<4x33xf32> -> vector<4x256xf32>
    %cst_138 = arith.constant 0.000000e+00 : f32
    %518 = vector.shape_cast %267 : vector<1x256xi1> to vector<1x256xi1>
    %519 = vector.broadcast %518 : vector<1x256xi1> to vector<4x256xi1>
    %520 = vector.broadcast %cst_138 : f32 to vector<4x256xf32>
    %521 = arith.select %519, %517, %520 : vector<4x256xi1>, vector<4x256xf32>
    %522 = vector.extract_strided_slice %288 {offsets = [0, 34], sizes = [4, 222], strides = [1, 1]} : vector<4x256xf32> to vector<4x222xf32>
    %523 = vector.extract_strided_slice %288 {offsets = [0, 0], sizes = [4, 34], strides = [1, 1]} : vector<4x256xf32> to vector<4x34xf32>
    %524 = tpu.concatenate %522, %523 in 1 : vector<4x222xf32>, vector<4x34xf32> -> vector<4x256xf32>
    %cst_139 = arith.constant 0.000000e+00 : f32
    %525 = vector.shape_cast %278 : vector<1x256xi1> to vector<1x256xi1>
    %526 = vector.broadcast %525 : vector<1x256xi1> to vector<4x256xi1>
    %527 = vector.broadcast %cst_139 : f32 to vector<4x256xf32>
    %528 = arith.select %526, %524, %527 : vector<4x256xi1>, vector<4x256xf32>
    %529 = tpu.concatenate %363, %370, %377, %384, %391, %398, %405, %412, %419, %426, %433, %440, %444, %451, %458, %465 in 0 : vector<4x256xf32>, vector<4x256xf32>, vector<4x256xf32>, vector<4x256xf32>, vector<4x256xf32>, vector<4x256xf32>, vector<4x256xf32>, vector<4x256xf32>, vector<4x256xf32>, vector<4x256xf32>, vector<4x256xf32>, vector<4x256xf32>, vector<4x256xf32>, vector<4x256xf32>, vector<4x256xf32>, vector<4x256xf32> -> vector<64x256xf32>
    %530 = tpu.concatenate %472, %479, %486, %493, %500, %507, %514, %521, %528 in 0 : vector<4x256xf32>, vector<4x256xf32>, vector<4x256xf32>, vector<4x256xf32>, vector<4x256xf32>, vector<4x256xf32>, vector<4x256xf32>, vector<4x256xf32>, vector<4x256xf32> -> vector<36x256xf32>
    %531 = tpu.concatenate %529, %530 in 0 : vector<64x256xf32>, vector<36x256xf32> -> vector<100x256xf32>
    %c0_140 = arith.constant 0 : index
    %c0_141 = arith.constant 0 : index
    %532 = vector.load %arg7[%c0_140, %c0_141] : memref<8x100xf32, #tpu.memory_space<vmem>>, vector<8x100xf32>
    %cst_142 = arith.constant dense<0.000000e+00> : vector<8x256xf32>
    %533 = tpu.matmul %532, %531, %cst_142 {dimension_numbers = #tpu.dot_dimension_numbers<[1], [0], [0], [1], [0, 0, 1, 1], [], []>} : vector<8x100xf32>, vector<100x256xf32>, vector<8x256xf32> -> vector<8x256xf32>
    %c0_143 = arith.constant 0 : index
    %c0_144 = arith.constant 0 : index
    %534 = vector.load %arg8[%c0_143, %c0_144] : memref<8x1xf32, #tpu.memory_space<vmem>>, vector<8x1xf32>
    %535 = vector.broadcast %534 : vector<8x1xf32> to vector<8x256xf32>
    %536 = arith.addf %533, %535 : vector<8x256xf32>
    %cst_145 = arith.constant 0.000000e+00 : f32
    %537 = vector.broadcast %cst_145 : f32 to vector<8x256xf32>
    %538 = arith.maximumf %536, %537 : vector<8x256xf32>
    %539 = vector.extract_strided_slice %1 {offsets = [0, 239], sizes = [4, 17], strides = [1, 1]} : vector<4x256xf32> to vector<4x17xf32>
    %540 = vector.extract_strided_slice %1 {offsets = [0, 0], sizes = [4, 239], strides = [1, 1]} : vector<4x256xf32> to vector<4x239xf32>
    %541 = tpu.concatenate %539, %540 in 1 : vector<4x17xf32>, vector<4x239xf32> -> vector<4x256xf32>
    %cst_146 = arith.constant 0xFF800000 : f32
    %542 = vector.shape_cast %80 : vector<1x256xi1> to vector<1x256xi1>
    %543 = vector.broadcast %542 : vector<1x256xi1> to vector<4x256xi1>
    %544 = vector.broadcast %cst_146 : f32 to vector<4x256xf32>
    %545 = arith.select %543, %541, %544 : vector<4x256xi1>, vector<4x256xf32>
    %546 = arith.maximumf %1, %545 : vector<4x256xf32>
    %547 = vector.extract_strided_slice %1 {offsets = [0, 240], sizes = [4, 16], strides = [1, 1]} : vector<4x256xf32> to vector<4x16xf32>
    %548 = vector.extract_strided_slice %1 {offsets = [0, 0], sizes = [4, 240], strides = [1, 1]} : vector<4x256xf32> to vector<4x240xf32>
    %549 = tpu.concatenate %547, %548 in 1 : vector<4x16xf32>, vector<4x240xf32> -> vector<4x256xf32>
    %cst_147 = arith.constant 0xFF800000 : f32
    %550 = vector.shape_cast %91 : vector<1x256xi1> to vector<1x256xi1>
    %551 = vector.broadcast %550 : vector<1x256xi1> to vector<4x256xi1>
    %552 = vector.broadcast %cst_147 : f32 to vector<4x256xf32>
    %553 = arith.select %551, %549, %552 : vector<4x256xi1>, vector<4x256xf32>
    %554 = arith.maximumf %546, %553 : vector<4x256xf32>
    %555 = vector.extract_strided_slice %1 {offsets = [0, 241], sizes = [4, 15], strides = [1, 1]} : vector<4x256xf32> to vector<4x15xf32>
    %556 = vector.extract_strided_slice %1 {offsets = [0, 0], sizes = [4, 241], strides = [1, 1]} : vector<4x256xf32> to vector<4x241xf32>
    %557 = tpu.concatenate %555, %556 in 1 : vector<4x15xf32>, vector<4x241xf32> -> vector<4x256xf32>
    %cst_148 = arith.constant 0xFF800000 : f32
    %558 = vector.shape_cast %102 : vector<1x256xi1> to vector<1x256xi1>
    %559 = vector.broadcast %558 : vector<1x256xi1> to vector<4x256xi1>
    %560 = vector.broadcast %cst_148 : f32 to vector<4x256xf32>
    %561 = arith.select %559, %557, %560 : vector<4x256xi1>, vector<4x256xf32>
    %562 = arith.maximumf %554, %561 : vector<4x256xf32>
    %563 = vector.extract_strided_slice %1 {offsets = [0, 255], sizes = [4, 1], strides = [1, 1]} : vector<4x256xf32> to vector<4x1xf32>
    %564 = vector.extract_strided_slice %1 {offsets = [0, 0], sizes = [4, 255], strides = [1, 1]} : vector<4x256xf32> to vector<4x255xf32>
    %565 = tpu.concatenate %563, %564 in 1 : vector<4x1xf32>, vector<4x255xf32> -> vector<4x256xf32>
    %cst_149 = arith.constant 0xFF800000 : f32
    %566 = vector.shape_cast %135 : vector<1x256xi1> to vector<1x256xi1>
    %567 = vector.broadcast %566 : vector<1x256xi1> to vector<4x256xi1>
    %568 = vector.broadcast %cst_149 : f32 to vector<4x256xf32>
    %569 = arith.select %567, %565, %568 : vector<4x256xi1>, vector<4x256xf32>
    %570 = arith.maximumf %562, %569 : vector<4x256xf32>
    %571 = vector.extract_strided_slice %1 {offsets = [0, 1], sizes = [4, 255], strides = [1, 1]} : vector<4x256xf32> to vector<4x255xf32>
    %572 = vector.extract_strided_slice %1 {offsets = [0, 0], sizes = [4, 1], strides = [1, 1]} : vector<4x256xf32> to vector<4x1xf32>
    %573 = tpu.concatenate %571, %572 in 1 : vector<4x255xf32>, vector<4x1xf32> -> vector<4x256xf32>
    %cst_150 = arith.constant 0xFF800000 : f32
    %574 = vector.shape_cast %157 : vector<1x256xi1> to vector<1x256xi1>
    %575 = vector.broadcast %574 : vector<1x256xi1> to vector<4x256xi1>
    %576 = vector.broadcast %cst_150 : f32 to vector<4x256xf32>
    %577 = arith.select %575, %573, %576 : vector<4x256xi1>, vector<4x256xf32>
    %578 = arith.maximumf %570, %577 : vector<4x256xf32>
    %579 = vector.extract_strided_slice %1 {offsets = [0, 15], sizes = [4, 241], strides = [1, 1]} : vector<4x256xf32> to vector<4x241xf32>
    %580 = vector.extract_strided_slice %1 {offsets = [0, 0], sizes = [4, 15], strides = [1, 1]} : vector<4x256xf32> to vector<4x15xf32>
    %581 = tpu.concatenate %579, %580 in 1 : vector<4x241xf32>, vector<4x15xf32> -> vector<4x256xf32>
    %cst_151 = arith.constant 0xFF800000 : f32
    %582 = vector.shape_cast %190 : vector<1x256xi1> to vector<1x256xi1>
    %583 = vector.broadcast %582 : vector<1x256xi1> to vector<4x256xi1>
    %584 = vector.broadcast %cst_151 : f32 to vector<4x256xf32>
    %585 = arith.select %583, %581, %584 : vector<4x256xi1>, vector<4x256xf32>
    %586 = arith.maximumf %578, %585 : vector<4x256xf32>
    %587 = vector.extract_strided_slice %1 {offsets = [0, 16], sizes = [4, 240], strides = [1, 1]} : vector<4x256xf32> to vector<4x240xf32>
    %588 = vector.extract_strided_slice %1 {offsets = [0, 0], sizes = [4, 16], strides = [1, 1]} : vector<4x256xf32> to vector<4x16xf32>
    %589 = tpu.concatenate %587, %588 in 1 : vector<4x240xf32>, vector<4x16xf32> -> vector<4x256xf32>
    %cst_152 = arith.constant 0xFF800000 : f32
    %590 = vector.shape_cast %201 : vector<1x256xi1> to vector<1x256xi1>
    %591 = vector.broadcast %590 : vector<1x256xi1> to vector<4x256xi1>
    %592 = vector.broadcast %cst_152 : f32 to vector<4x256xf32>
    %593 = arith.select %591, %589, %592 : vector<4x256xi1>, vector<4x256xf32>
    %594 = arith.maximumf %586, %593 : vector<4x256xf32>
    %595 = vector.extract_strided_slice %1 {offsets = [0, 17], sizes = [4, 239], strides = [1, 1]} : vector<4x256xf32> to vector<4x239xf32>
    %596 = vector.extract_strided_slice %1 {offsets = [0, 0], sizes = [4, 17], strides = [1, 1]} : vector<4x256xf32> to vector<4x17xf32>
    %597 = tpu.concatenate %595, %596 in 1 : vector<4x239xf32>, vector<4x17xf32> -> vector<4x256xf32>
    %cst_153 = arith.constant 0xFF800000 : f32
    %598 = vector.shape_cast %212 : vector<1x256xi1> to vector<1x256xi1>
    %599 = vector.broadcast %598 : vector<1x256xi1> to vector<4x256xi1>
    %600 = vector.broadcast %cst_153 : f32 to vector<4x256xf32>
    %601 = arith.select %599, %597, %600 : vector<4x256xi1>, vector<4x256xf32>
    %602 = arith.maximumf %594, %601 : vector<4x256xf32>
    %603 = vector.extract_strided_slice %602 {offsets = [0, 239], sizes = [4, 17], strides = [1, 1]} : vector<4x256xf32> to vector<4x17xf32>
    %604 = vector.extract_strided_slice %602 {offsets = [0, 0], sizes = [4, 239], strides = [1, 1]} : vector<4x256xf32> to vector<4x239xf32>
    %605 = tpu.concatenate %603, %604 in 1 : vector<4x17xf32>, vector<4x239xf32> -> vector<4x256xf32>
    %cst_154 = arith.constant 0.000000e+00 : f32
    %606 = vector.shape_cast %80 : vector<1x256xi1> to vector<1x256xi1>
    %607 = vector.broadcast %606 : vector<1x256xi1> to vector<4x256xi1>
    %608 = vector.broadcast %cst_154 : f32 to vector<4x256xf32>
    %609 = arith.select %607, %605, %608 : vector<4x256xi1>, vector<4x256xf32>
    %610 = vector.extract_strided_slice %602 {offsets = [0, 240], sizes = [4, 16], strides = [1, 1]} : vector<4x256xf32> to vector<4x16xf32>
    %611 = vector.extract_strided_slice %602 {offsets = [0, 0], sizes = [4, 240], strides = [1, 1]} : vector<4x256xf32> to vector<4x240xf32>
    %612 = tpu.concatenate %610, %611 in 1 : vector<4x16xf32>, vector<4x240xf32> -> vector<4x256xf32>
    %cst_155 = arith.constant 0.000000e+00 : f32
    %613 = vector.shape_cast %91 : vector<1x256xi1> to vector<1x256xi1>
    %614 = vector.broadcast %613 : vector<1x256xi1> to vector<4x256xi1>
    %615 = vector.broadcast %cst_155 : f32 to vector<4x256xf32>
    %616 = arith.select %614, %612, %615 : vector<4x256xi1>, vector<4x256xf32>
    %617 = vector.extract_strided_slice %602 {offsets = [0, 241], sizes = [4, 15], strides = [1, 1]} : vector<4x256xf32> to vector<4x15xf32>
    %618 = vector.extract_strided_slice %602 {offsets = [0, 0], sizes = [4, 241], strides = [1, 1]} : vector<4x256xf32> to vector<4x241xf32>
    %619 = tpu.concatenate %617, %618 in 1 : vector<4x15xf32>, vector<4x241xf32> -> vector<4x256xf32>
    %cst_156 = arith.constant 0.000000e+00 : f32
    %620 = vector.shape_cast %102 : vector<1x256xi1> to vector<1x256xi1>
    %621 = vector.broadcast %620 : vector<1x256xi1> to vector<4x256xi1>
    %622 = vector.broadcast %cst_156 : f32 to vector<4x256xf32>
    %623 = arith.select %621, %619, %622 : vector<4x256xi1>, vector<4x256xf32>
    %624 = vector.extract_strided_slice %602 {offsets = [0, 255], sizes = [4, 1], strides = [1, 1]} : vector<4x256xf32> to vector<4x1xf32>
    %625 = vector.extract_strided_slice %602 {offsets = [0, 0], sizes = [4, 255], strides = [1, 1]} : vector<4x256xf32> to vector<4x255xf32>
    %626 = tpu.concatenate %624, %625 in 1 : vector<4x1xf32>, vector<4x255xf32> -> vector<4x256xf32>
    %cst_157 = arith.constant 0.000000e+00 : f32
    %627 = vector.shape_cast %135 : vector<1x256xi1> to vector<1x256xi1>
    %628 = vector.broadcast %627 : vector<1x256xi1> to vector<4x256xi1>
    %629 = vector.broadcast %cst_157 : f32 to vector<4x256xf32>
    %630 = arith.select %628, %626, %629 : vector<4x256xi1>, vector<4x256xf32>
    %cst_158 = arith.constant 0.000000e+00 : f32
    %631 = vector.shape_cast %146 : vector<1x256xi1> to vector<1x256xi1>
    %632 = vector.broadcast %631 : vector<1x256xi1> to vector<4x256xi1>
    %633 = vector.broadcast %cst_158 : f32 to vector<4x256xf32>
    %634 = arith.select %632, %602, %633 : vector<4x256xi1>, vector<4x256xf32>
    %635 = vector.extract_strided_slice %602 {offsets = [0, 1], sizes = [4, 255], strides = [1, 1]} : vector<4x256xf32> to vector<4x255xf32>
    %636 = vector.extract_strided_slice %602 {offsets = [0, 0], sizes = [4, 1], strides = [1, 1]} : vector<4x256xf32> to vector<4x1xf32>
    %637 = tpu.concatenate %635, %636 in 1 : vector<4x255xf32>, vector<4x1xf32> -> vector<4x256xf32>
    %cst_159 = arith.constant 0.000000e+00 : f32
    %638 = vector.shape_cast %157 : vector<1x256xi1> to vector<1x256xi1>
    %639 = vector.broadcast %638 : vector<1x256xi1> to vector<4x256xi1>
    %640 = vector.broadcast %cst_159 : f32 to vector<4x256xf32>
    %641 = arith.select %639, %637, %640 : vector<4x256xi1>, vector<4x256xf32>
    %642 = vector.extract_strided_slice %602 {offsets = [0, 15], sizes = [4, 241], strides = [1, 1]} : vector<4x256xf32> to vector<4x241xf32>
    %643 = vector.extract_strided_slice %602 {offsets = [0, 0], sizes = [4, 15], strides = [1, 1]} : vector<4x256xf32> to vector<4x15xf32>
    %644 = tpu.concatenate %642, %643 in 1 : vector<4x241xf32>, vector<4x15xf32> -> vector<4x256xf32>
    %cst_160 = arith.constant 0.000000e+00 : f32
    %645 = vector.shape_cast %190 : vector<1x256xi1> to vector<1x256xi1>
    %646 = vector.broadcast %645 : vector<1x256xi1> to vector<4x256xi1>
    %647 = vector.broadcast %cst_160 : f32 to vector<4x256xf32>
    %648 = arith.select %646, %644, %647 : vector<4x256xi1>, vector<4x256xf32>
    %649 = vector.extract_strided_slice %602 {offsets = [0, 16], sizes = [4, 240], strides = [1, 1]} : vector<4x256xf32> to vector<4x240xf32>
    %650 = vector.extract_strided_slice %602 {offsets = [0, 0], sizes = [4, 16], strides = [1, 1]} : vector<4x256xf32> to vector<4x16xf32>
    %651 = tpu.concatenate %649, %650 in 1 : vector<4x240xf32>, vector<4x16xf32> -> vector<4x256xf32>
    %cst_161 = arith.constant 0.000000e+00 : f32
    %652 = vector.shape_cast %201 : vector<1x256xi1> to vector<1x256xi1>
    %653 = vector.broadcast %652 : vector<1x256xi1> to vector<4x256xi1>
    %654 = vector.broadcast %cst_161 : f32 to vector<4x256xf32>
    %655 = arith.select %653, %651, %654 : vector<4x256xi1>, vector<4x256xf32>
    %656 = vector.extract_strided_slice %602 {offsets = [0, 17], sizes = [4, 239], strides = [1, 1]} : vector<4x256xf32> to vector<4x239xf32>
    %657 = vector.extract_strided_slice %602 {offsets = [0, 0], sizes = [4, 17], strides = [1, 1]} : vector<4x256xf32> to vector<4x17xf32>
    %658 = tpu.concatenate %656, %657 in 1 : vector<4x239xf32>, vector<4x17xf32> -> vector<4x256xf32>
    %cst_162 = arith.constant 0.000000e+00 : f32
    %659 = vector.shape_cast %212 : vector<1x256xi1> to vector<1x256xi1>
    %660 = vector.broadcast %659 : vector<1x256xi1> to vector<4x256xi1>
    %661 = vector.broadcast %cst_162 : f32 to vector<4x256xf32>
    %662 = arith.select %660, %658, %661 : vector<4x256xi1>, vector<4x256xf32>
    %663 = tpu.concatenate %609, %616, %623, %630, %634, %641, %648, %655, %662 in 0 : vector<4x256xf32>, vector<4x256xf32>, vector<4x256xf32>, vector<4x256xf32>, vector<4x256xf32>, vector<4x256xf32>, vector<4x256xf32>, vector<4x256xf32>, vector<4x256xf32> -> vector<36x256xf32>
    %c0_163 = arith.constant 0 : index
    %c0_164 = arith.constant 0 : index
    %664 = vector.load %arg9[%c0_163, %c0_164] : memref<8x36xf32, #tpu.memory_space<vmem>>, vector<8x36xf32>
    %cst_165 = arith.constant dense<0.000000e+00> : vector<8x256xf32>
    %665 = tpu.matmul %664, %663, %cst_165 {dimension_numbers = #tpu.dot_dimension_numbers<[1], [0], [0], [1], [0, 0, 1, 1], [], []>} : vector<8x36xf32>, vector<36x256xf32>, vector<8x256xf32> -> vector<8x256xf32>
    %c0_166 = arith.constant 0 : index
    %c0_167 = arith.constant 0 : index
    %666 = vector.load %arg10[%c0_166, %c0_167] : memref<8x1xf32, #tpu.memory_space<vmem>>, vector<8x1xf32>
    %667 = vector.broadcast %666 : vector<8x1xf32> to vector<8x256xf32>
    %668 = arith.addf %665, %667 : vector<8x256xf32>
    %cst_168 = arith.constant 0.000000e+00 : f32
    %669 = vector.broadcast %cst_168 : f32 to vector<8x256xf32>
    %670 = arith.maximumf %668, %669 : vector<8x256xf32>
    %c0_169 = arith.constant 0 : index
    %c0_170 = arith.constant 0 : index
    %c0_171 = arith.constant 0 : index
    %671 = vector.load %arg11[%c0_169, %c0_170, %c0_171] : memref<1x32x256xf32, #tpu.memory_space<vmem>>, vector<1x8x256xf32>
    %672 = vector.shape_cast %671 : vector<1x8x256xf32> to vector<8x256xf32>
    %673 = vector.shape_cast %286 : vector<8x256xf32> to vector<1x8x256xf32>
    tpu.vector_store %arg11[%c0_169, %c0_170, %c0_171], %673 {strides = array<i32>} : memref<1x32x256xf32, #tpu.memory_space<vmem>>, vector<1x8x256xf32>,
    %c0_172 = arith.constant 0 : index
    %c8 = arith.constant 8 : index
    %c0_173 = arith.constant 0 : index
    %674 = vector.load %arg11[%c0_172, %c8, %c0_173] : memref<1x32x256xf32, #tpu.memory_space<vmem>>, vector<1x8x256xf32>
    %675 = vector.shape_cast %674 : vector<1x8x256xf32> to vector<8x256xf32>
    %676 = vector.shape_cast %356 : vector<8x256xf32> to vector<1x8x256xf32>
    tpu.vector_store %arg11[%c0_172, %c8, %c0_173], %676 {strides = array<i32>} : memref<1x32x256xf32, #tpu.memory_space<vmem>>, vector<1x8x256xf32>,
    %c0_174 = arith.constant 0 : index
    %c16 = arith.constant 16 : index
    %c0_175 = arith.constant 0 : index
    %677 = vector.load %arg11[%c0_174, %c16, %c0_175] : memref<1x32x256xf32, #tpu.memory_space<vmem>>, vector<1x8x256xf32>
    %678 = vector.shape_cast %677 : vector<1x8x256xf32> to vector<8x256xf32>
    %679 = vector.shape_cast %538 : vector<8x256xf32> to vector<1x8x256xf32>
    tpu.vector_store %arg11[%c0_174, %c16, %c0_175], %679 {strides = array<i32>} : memref<1x32x256xf32, #tpu.memory_space<vmem>>, vector<1x8x256xf32>,
    %c0_176 = arith.constant 0 : index
    %c24 = arith.constant 24 : index
    %c0_177 = arith.constant 0 : index
    %680 = vector.load %arg11[%c0_176, %c24, %c0_177] : memref<1x32x256xf32, #tpu.memory_space<vmem>>, vector<1x8x256xf32>
    %681 = vector.shape_cast %680 : vector<1x8x256xf32> to vector<8x256xf32>
    %682 = vector.shape_cast %670 : vector<8x256xf32> to vector<1x8x256xf32>
    tpu.vector_store %arg11[%c0_176, %c24, %c0_177], %682 {strides = array<i32>} : memref<1x32x256xf32, #tpu.memory_space<vmem>>, vector<1x8x256xf32>,
    return
  }
  func.func @transform_0(%arg0: i32) -> (i32, i32) {
    %c0_i32 = arith.constant 0 : i32
    %c0_i32_0 = arith.constant 0 : i32
    %c0_i32_1 = arith.constant 0 : i32
    return %c0_i32, %c0_i32_0 : i32, i32
  }
  func.func @transform_1(%arg0: i32) -> (i32, i32, i32) {
    %c0_i32 = arith.constant 0 : i32
    %c0_i32_0 = arith.constant 0 : i32
    %c0_i32_1 = arith.constant 0 : i32
    return %arg0, %c0_i32, %c0_i32_0 : i32, i32, i32
  }
  func.func @transform_2(%arg0: i32) -> (i32, i32) {
    %c0_i32 = arith.constant 0 : i32
    %c0_i32_0 = arith.constant 0 : i32
    %c0_i32_1 = arith.constant 0 : i32
    return %c0_i32, %c0_i32_0 : i32, i32
  }
  func.func @transform_3(%arg0: i32) -> (i32, i32) {
    %c0_i32 = arith.constant 0 : i32
    %c0_i32_0 = arith.constant 0 : i32
    %c0_i32_1 = arith.constant 0 : i32
    return %c0_i32, %c0_i32_0 : i32, i32
  }
  func.func @transform_4(%arg0: i32) -> (i32, i32) {
    %c0_i32 = arith.constant 0 : i32
    %c0_i32_0 = arith.constant 0 : i32
    %c0_i32_1 = arith.constant 0 : i32
    return %c0_i32, %c0_i32_0 : i32, i32
  }
  func.func @transform_5(%arg0: i32) -> (i32, i32) {
    %c0_i32 = arith.constant 0 : i32
    %c0_i32_0 = arith.constant 0 : i32
    %c0_i32_1 = arith.constant 0 : i32
    return %c0_i32, %c0_i32_0 : i32, i32
  }
  func.func @transform_6(%arg0: i32) -> (i32, i32) {
    %c0_i32 = arith.constant 0 : i32
    %c0_i32_0 = arith.constant 0 : i32
    %c0_i32_1 = arith.constant 0 : i32
    return %c0_i32, %c0_i32_0 : i32, i32
  }
  func.func @transform_7(%arg0: i32) -> (i32, i32) {
    %c0_i32 = arith.constant 0 : i32
    %c0_i32_0 = arith.constant 0 : i32
    %c0_i32_1 = arith.constant 0 : i32
    return %c0_i32, %c0_i32_0 : i32, i32
  }
  func.func @transform_8(%arg0: i32) -> (i32, i32) {
    %c0_i32 = arith.constant 0 : i32
    %c0_i32_0 = arith.constant 0 : i32
    %c0_i32_1 = arith.constant 0 : i32
    return %c0_i32, %c0_i32_0 : i32, i32
  }
  func.func @transform_9(%arg0: i32) -> (i32, i32) {
    %c0_i32 = arith.constant 0 : i32
    %c0_i32_0 = arith.constant 0 : i32
    %c0_i32_1 = arith.constant 0 : i32
    return %c0_i32, %c0_i32_0 : i32, i32
  }
  func.func @transform_10(%arg0: i32) -> (i32, i32, i32) {
    %c0_i32 = arith.constant 0 : i32
    %c0_i32_0 = arith.constant 0 : i32
    %c0_i32_1 = arith.constant 0 : i32
    return %arg0, %c0_i32, %c0_i32_0 : i32, i32, i32
  }
}

</mosaic_0001>

<bundles_post_ra>
// kernel: inception_forward.1
= control target key start
LH: loop header
LB: loop body
LE: loop exit
PB: predicated region body
PF: predicated region fallthrough
CT: control target
= control target key end

     0   :  { %s2164_s13 = smov 0   ;;  %s3528_s0 = inlined_call_operand.vmem [shape: s32[2,256], index: 0, kind: input, shape index: {}]   ;;  %s3529_s1 = inlined_call_operand.vmem [shape: f32[2,4,256], index: 1, kind: input, shape index: {}]   ;;  %s3530_s2 = inlined_call_operand.vmem [shape: f32[16,4], index: 2, kind: input, shape index: {}]   ;;  %s3531_s3 = inlined_call_operand.vmem [shape: f32[16,1], index: 3, kind: input, shape index: {}]   ;;  %s3532_s4 = inlined_call_operand.vmem [shape: f32[8,36], index: 4, kind: input, shape index: {}]   ;;  %s3533_s5 = inlined_call_operand.vmem [shape: f32[8,1], index: 5, kind: input, shape index: {}]   ;;  %s3534_s6 = inlined_call_operand.vmem [shape: f32[8,100], index: 6, kind: input, shape index: {}]   ;;  %s3535_s7 = inlined_call_operand.vmem [shape: f32[8,1], index: 7, kind: input, shape index: {}]   ;;  %s3536_s8 = inlined_call_operand.vmem [shape: f32[8,36], index: 8, kind: input, shape index: {}]   ;;  %s3537_s9 = inlined_call_operand.vmem [shape: f32[8,1], index: 9, kind: input, shape index: {}]   ;;  %s3538_s10 = inlined_call_operand.vmem [shape: f32[2,32,256], index: 10, kind: output, shape index: {}]  }
   0x1 LB: > { %s1826_s14 = sadd.s32 4294967295, %s2081_s13   ;;  %p1830_p0 = scmp.ge.s32.totalorder %s2081_s13, 1  ;;  %s2081_s13 = sphi %s2164_s13, %s20_s13  }
   0x2   : > { %p312_p1 = scmp.lt.s32.totalorder %s2081_s13, 3 }
   0x4   : > { %p313_p2 = pnand %p1830_p0, %p312_p1 }
   0x6   : > { %316 = sbr.rel (%p313_p2) target bundleno = 667 (0x29b), region = 60 }
   0xd   : > { %v442_v0 = vld [vmem:[%s3531_s3 + $0x8] sm:$0xff]  ;;  %p350_p3 = scmp.lt.s32.totalorder %s1826_s14, 1  ;;  %v2083_v1 = vmov 0   ;;  %v3592_v2 = vmov 0.0   ;;  %vm3539_vm0 = vcmask 1043456   ;;  %s2085_s21 = smov 16   ;;  %v559_v10 = vlaneseq }
   0xe   : > { %1927 = vset.pattern.permute.xlu0 %v2083_v1  ;;  %531 = vmatprep.mubr.f32.mxu1 %v3592_v2  ;;  %s2086_s22 = smov 17   ;;  %v439_v5 = vld [vmem:[%s3530_s2] sm:$0xff]  ;;  %vm455_vm1 = vcmask 31744   ;;  %v440_v6 = vld [vmem:[%s3530_s2 + $0x8] sm:$0xff]  ;;  %s2087_s27 = smov 15   ;;  %v3609_v27 = vmov 0 }
   0xf   : > { %450 = vperm.xlu0 %1927, %v442_v0   ;;  %s3969_s14 = smov (!%p350_p3, %s1826_s14), 1  ;;  %1412 = vmatprep.mubr.f32.mxu0 %v3592_v2  ;;  %s2088_s28 = smov 1   ;;  %v2227_v7 = vld [vmem:[%s3528_s0] ss:$2 sm:$0x3]  ;;  %v560_v12 = vshrl.u32 %v559_v10, 7 }
  0x10   : > { %2073 = vset.pattern.permute.xlu1 %v2083_v1  ;;  %s1851_s17 = sshll.u32 %s3969_s14, 3  ;;  %s2089_s29 = smov 127   ;;  %v2232_v8 = vld [vmem:[%s3528_s0 + $0x1] ss:$2 sm:$0x3]  ;;  %vm387_vm2 = vcmp.ge.s32.totalorder %v2227_v7, 1 }
  0x11   : > { %s354_s20 = scalar_lea.vmem %s3529_s1, %s1851_s17  ;;  %s2090_s30 = smov 113   ;;  %vm388_vm3 = vcmp.lt.s32.totalorder %v2227_v7, 17  ;;  %vm3541_vm4 = vcmp.ge.s32.totalorder %v2232_v8, 0  ;;  %vm3540_vm6 = vcmp.lt.s32.totalorder %v2232_v8, 16  ;;  %vm3545_vm8 = vcmp.ge.s32.totalorder %v2232_v8, 1 }
  0x12   : > { %v2185_v3 = vld [vmem:[%s354_s20] sm:$0xff]  ;;  %s2091_s11 = smov 112   ;;  %s2092_s12 = smov 111   ;;  %vm2237_vm5 = vmand %vm387_vm2, %vm388_vm3  ;;  %vm3543_vm10 = vcmp.ge.s32.totalorder %v2232_v8, 4294967295  ;;  %vm3550_vm11 = vcmp.lt.s32.totalorder %v2232_v8, 17  ;;  %vm400_vm13 = vcmp.ge.s32.totalorder %v2227_v7, 0 }
  0x13   : > { %v454_v4 = vcombine.high %v2185_v3, %v2185_v3  ;;  %1440 = vrot.lane.b32.xlu0 %v2185_v3, %s2085_s21  ;;  %1424 = vrot.lane.b32.xlu1 %v2185_v3, %s2086_s22  ;;  %vm394_vm7 = vmand %vm2237_vm5, %vm3541_vm4  ;;  %vm401_vm14 = vcmp.lt.s32.totalorder %v2227_v7, 16  ;;  %vm3546_vm15 = vcmp.lt.s32.totalorder %v2232_v8, 15  ;;  %v2265_v15 = vsub.s32 0, %v560_v12  ;;  %s2093_s19 = smov 34   ;;  %s2094_s20 = smov 32  }
  0x14   : > { %vm395_vm9 = vmand %vm394_vm7, %vm3540_vm6  ;;  %v2271_v17 = vsub.s32 1, %v560_v12  ;;  %v3611_v28 = vmov 0  ;;  %vm3544_vm6 = vcmask 138240   ;;  %v3613_v34 = vmov 0  ;;  %s2095_s23 = smov 33   ;;  %s2096_s24 = smov 31  }
  0x15   : > { %1836 = vmatprep.subr.msk.mxu1 %vm3539_vm0, %v454_v4  ;;  %vm392_vm12 = vmand %vm2237_vm5, %vm3545_vm8  ;;  %v581_v14 = vsel %vm395_vm9, 1, %v2083_v1  ;;  %v3615_v35 = vmov 0  ;;  %v3617_v36 = vmov 0  ;;  %v3619_v43 = vmov 0  ;;  %s2097_s25 = smov 30   ;;  %s2098_s26 = smov 18  }
  0x16   : > { %1837 = vmatpush1.msk.msra.mxu1 %vm3539_vm0, %v2185_v3  ;;  %vm393_vm2 = vmand %vm392_vm12, %vm3550_vm11  ;;  %v585_v19 = vrot.slane %v581_v14, %v2265_v15  ;;  %v589_v22 = vrot.slane %v581_v14, %v2271_v17  ;;  %vm3542_vm12 = vcmask 130048   ;;  %v3621_v46 = vmov 0  ;;  %s2099_s15 = smov 2   ;;  %s2100_s16 = smov 14  }
  0x17   : > { %1838 = vmatmul.mubr.msk.f32.vlgmr.msra.gmra.mrb[0].mxu1 %vm455_vm1, %v439_v5  ;;  %1437 = vrot.lane.b32.xlu1 %v454_v4, %s2085_s21  ;;  %vm2267_vm3 = vmand %vm400_vm13, %vm401_vm14  ;;  %v558_v20 = vsel %vm393_vm2, 1, %v2083_v1  ;;  %vm413_vm13 = vcmp.ge.s32.totalorder %v2227_v7, 4294967295  ;;  %vm414_vm14 = vcmp.lt.s32.totalorder %v2227_v7, 15  ;;  %v3624_v63 = vmov 0  ;;  %s2102_s17 = smov 114   ;;  %s2108_s18 = smov 94  }
  0x18   : > { %537 = vmatprep.mubr.f32.mxu1 %v3592_v2  ;;  %1421 = vrot.lane.b32.xlu0 %v454_v4, %s2086_s22  ;;  %vm405_vm9 = vmand %vm2267_vm3, %vm3545_vm8  ;;  %v562_v24 = vrot.slane %v558_v20, %v2265_v15  ;;  %v566_v25 = vrot.slane %v558_v20, %v2271_v17  ;;  %vm2295_vm0 = vcmp.eq.s32.totalorder %v589_v22, 1  ;;  %v3626_v0 = vmov 0 }
  0x19   : > { %vm406_vm2 = vmand %vm405_vm9, %vm3550_vm11  ;;  %v3612_v28 = vsel %vm2295_vm0, 4294967295, %v3611_v28  ;;  %v3631_v14 = vmov 0  ;;  %v3688_v16 = vmov 0 }
  0x1a   : > { %vm2307_vm9 = vmand %vm413_vm13, %vm414_vm14  ;;  %vm2311_vm4 = vcmp.eq.s32.totalorder %v562_v24, 1  ;;  %v627_v37 = vsel %vm406_vm2, 1, %v2083_v1  ;;  %vm3549_vm14 = vcmask 121856  }
  0x1b   : > { %1839 = vmatmul.mubr.msk.f32.gmra.mrb[2].mxu1 %vm455_vm1, %v440_v6  ;;  %1453 = vrot.lane.b32.xlu1 %v454_v4, %s2087_s27  ;;  %vm396_vm1 = vmand %vm2237_vm5, %vm3543_vm10  ;;  %v3614_v34 = vsel %vm2307_vm9, 4294967295, %v3613_v34  ;;  %v3616_v35 = vsel %vm2311_vm4, 4294967295, %v3615_v35  ;;  %v631_v47 = vrot.slane %v627_v37, %v2265_v15  ;;  %v635_v50 = vrot.slane %v627_v37, %v2271_v17 }
  0x1c   : > { %1456 = vrot.lane.b32.xlu0 %v2185_v3, %s2087_s27  ;;  %858 = vmatprep.mubr.f32.mxu1 %v3592_v2  ;;  %vm397_vm7 = vmand %vm396_vm1, %vm3546_vm15  ;;  %vm2289_vm1 = vcmp.eq.s32.totalorder %v585_v19, 1  ;;  %v3635_v37 = vmov 0 }
  0x1d   : > { %v604_v23 = vsel %vm397_vm7, 1, %v2083_v1  ;;  %v3610_v27 = vsel %vm2289_vm1, 4294967295, %v3609_v27  ;;  %vm409_vm7 = vmand %vm2267_vm3, %vm3543_vm10 }
  0x1e   : > { %v608_v31 = vrot.slane %v604_v23, %v2265_v15  ;;  %v612_v32 = vrot.slane %v604_v23, %v2271_v17  ;;  %vm410_vm13 = vmand %vm409_vm7, %vm3546_vm15  ;;  %vm3623_vm15 = vcmp.ge.s32.totalorder %v2232_v8, 0 }
  0x1f   : > { %1469 = vrot.lane.b32.xlu1 %v454_v4, %s2088_s28  ;;  %vm418_vm2 = vmand %vm2307_vm9, %vm3545_vm8  ;;  %v663_v51 = vsel %vm410_vm13, 1, %v2083_v1  ;;  %vm3553_vm8 = vcmask 7168   ;;  %vm2362_vm13 = vcmp.eq.s32.totalorder %v631_v47, 1 }
  0x20   : > { %1472 = vrot.lane.b32.xlu0 %v2185_v3, %s2088_s28  ;;  %vm2328_vm10 = vcmp.eq.s32.totalorder %v608_v31, 1  ;;  %vm2340_vm7 = vcmp.eq.s32.totalorder %v612_v32, 1  ;;  %v667_v59 = vrot.slane %v663_v51, %v2265_v15  ;;  %v671_v60 = vrot.slane %v663_v51, %v2271_v17 }
  0x21   : > { %v3620_v43 = vsel %vm2328_vm10, 4294967295, %v3619_v43  ;;  %v3622_v46 = vsel %vm2340_vm7, 4294967295, %v3621_v46  ;;  %v3625_v63 = vsel %vm2362_vm13, 4294967295, %v3624_v63 }
  0x23   : > { %1485 = vrot.lane.b32.xlu1 %v2185_v3, %s2089_s29 }
  0x24   : > { %1487 = vrot.lane.b32.xlu0 %v454_v4, %s2089_s29 }
  0x27   : > { %1501 = vrot.lane.b32.xlu1 %v2185_v3, %s2090_s30 }
  0x28   : > { %1503 = vrot.lane.b32.xlu0 %v454_v4, %s2090_s30 }
  0x2b   : > { %1517 = vrot.lane.b32.xlu1 %v2185_v3, %s2091_s11 }
  0x2c   : > { %1519 = vrot.lane.b32.xlu0 %v454_v4, %s2091_s11 }
  0x2f   : > { %1533 = vrot.lane.b32.xlu1 %v2185_v3, %s2092_s12 }
  0x30   : > { %1535 = vrot.lane.b32.xlu0 %v454_v4, %s2092_s12 }
  0x85   : > { %v1425_v11 = vpop.permute.xlu1 %1424 }
  0x89   : > { %v1438_v13 = vpop.permute.xlu1 %1437 }
  0x8d   : > { %v1454_v21 = vpop.permute.xlu1 %1453 }
  0x8e   : > { %v2275_v18 = vpop.permute.xlu0 %450 }
  0x91   : > { %v1470_v33 = vpop.permute.xlu1 %1469 }
  0x92   : > { %v1441_v26 = vpop.permute.xlu0 %1440 }
  0x93   : > { %v1442_v29 = vsel %vm3542_vm12, %v1441_v26, %v1438_v13  ;;  %v1445_v30 = vsel %vm3542_vm12, %v1438_v13, %v1441_v26  ;;  %vm2315_vm12 = vcmp.eq.s32.totalorder %v566_v25, 1  ;;  %v3629_v13 = vmov 0 }
  0x94   : > { %v3618_v36 = vsel %vm2315_vm12, 4294967295, %v3617_v36  ;;  %v1446_v38 = vsel %vm2289_vm1, %v1445_v30, -inf  ;;  %v1447_v39 = vsel %vm2295_vm0, %v1442_v29, -inf  ;;  %vm3589_vm0 = vcmp.ge.s32.totalorder %v2232_v8, 4294967294 }
  0x95   : > { %v1450_v48 = vcombine.low %v1446_v38, %v1447_v39  ;;  %v1486_v53 = vpop.permute.xlu1 %1485  ;;  %v3637_v38 = vmov 0 }
  0x96   : > { %v1422_v40 = vpop.permute.xlu0 %1421 }
  0x97   : > { %v1426_v41 = vsel %vm3544_vm6, %v1425_v11, %v1422_v40  ;;  %v1429_v42 = vsel %vm3544_vm6, %v1422_v40, %v1425_v11  ;;  %vm419_vm6 = vmand %vm418_vm2, %vm3550_vm11  ;;  %vm2366_vm2 = vcmp.eq.s32.totalorder %v635_v50, 1  ;;  %vm3558_vm11 = vcmask 1039360  }
  0x98   : > { %v1430_v44 = vsel %vm2311_vm4, %v1429_v42, -inf  ;;  %v1431_v45 = vsel %vm2315_vm12, %v1426_v41, -inf  ;;  %vm420_vm4 = vmand %vm2307_vm9, %vm3623_vm15  ;;  %v3627_v0 = vsel %vm2366_vm2, 4294967295, %v3626_v0  ;;  %v686_v4 = vsel %vm419_vm6, 1, %v2083_v1 }
  0x99   : > { %v1434_v49 = vcombine.low %v1430_v44, %v1431_v45  ;;  %vm3628_vm15 = vcmp.lt.s32.totalorder %v2232_v8, 16  ;;  %vm2383_vm6 = vcmp.eq.s32.totalorder %v671_v60, 1  ;;  %v1502_v19 = vpop.permute.xlu1 %1501  ;;  %v694_v22 = vrot.slane %v686_v4, %v2271_v17 }
  0x9a   : > { %v1457_v52 = vpop.permute.xlu0 %1456  ;;  %v3632_v14 = vsel %vm2383_vm6, 4294967295, %v3631_v14  ;;  %v3639_v50 = vmov 0 }
  0x9b   : > { %v1436_v54 = vmax.f32 %v2185_v3, %v1434_v49  ;;  %v1458_v55 = vsel %vm3549_vm14, %v1457_v52, %v1454_v21  ;;  %v1461_v56 = vsel %vm3549_vm14, %v1454_v21, %v1457_v52  ;;  %vm421_vm14 = vmand %vm420_vm4, %vm3628_vm15  ;;  %vm3633_vm4 = vcmp.ge.s32.totalorder %v2232_v8, 4294967295 }
  0x9c   : > { %v1462_v57 = vsel %vm2328_vm10, %v1461_v56, -inf  ;;  %v1463_v58 = vsel %vm2340_vm7, %v1458_v55, -inf  ;;  %vm2379_vm10 = vcmp.eq.s32.totalorder %v667_v59, 1  ;;  %vm422_vm15 = vmand %vm2307_vm9, %vm3633_vm4  ;;  %v690_v21 = vrot.slane %v686_v4, %v2265_v15 }
  0x9d   : > { %v1452_v61 = vmax.f32 %v1436_v54, %v1450_v48  ;;  %v1466_v62 = vcombine.low %v1462_v57, %v1463_v58  ;;  %v3630_v13 = vsel %vm2379_vm10, 4294967295, %v3629_v13  ;;  %v709_v23 = vsel %vm421_vm14, 1, %v2083_v1  ;;  %v1518_v41 = vpop.permute.xlu1 %1517 }
  0x9e   : > { %v1473_v3 = vpop.permute.xlu0 %1472  ;;  %vm3559_vm4 = vcmask 924672   ;;  %v713_v32 = vrot.slane %v709_v23, %v2265_v15  ;;  %vm2403_vm14 = vcmp.eq.s32.totalorder %v690_v21, 1  ;;  %vm2407_vm12 = vcmp.eq.s32.totalorder %v694_v22, 1 }
  0x9f   : > { %v1468_v5 = vmax.f32 %v1452_v61, %v1466_v62  ;;  %v1474_v6 = vsel %vm3553_vm8, %v1473_v3, %v1470_v33  ;;  %v1477_v10 = vsel %vm3553_vm8, %v1470_v33, %v1473_v3  ;;  %vm3634_vm8 = vcmp.lt.s32.totalorder %v2232_v8, 15 }
  0xa0   : > { %v1478_v11 = vsel %vm2362_vm13, %v1477_v10, -inf  ;;  %v1479_v12 = vsel %vm2366_vm2, %v1474_v6, -inf  ;;  %vm423_vm7 = vmand %vm422_vm15, %vm3634_vm8  ;;  %v3636_v37 = vsel %vm2403_vm14, 4294967295, %v3635_v37  ;;  %v3638_v38 = vsel %vm2407_vm12, 4294967295, %v3637_v38 }
  0xa1   : > { %v1482_v20 = vcombine.low %v1478_v11, %v1479_v12  ;;  %v717_v39 = vrot.slane %v709_v23, %v2271_v17  ;;  %v732_v42 = vsel %vm423_vm7, 1, %v2083_v1  ;;  %vm3563_vm8 = vcmask 916480   ;;  %v1534_v61 = vpop.permute.xlu1 %1533 }
  0xa2   : > { %v1488_v24 = vpop.permute.xlu0 %1487  ;;  %vm2419_vm15 = vcmp.eq.s32.totalorder %v713_v32, 1  ;;  %v3641_v52 = vmov 0  ;;  %v740_v54 = vrot.slane %v732_v42, %v2271_v17  ;;  %vm3562_vm7 = vcmask 908288  }
  0xa3   : > { %v1484_v25 = vmax.f32 %v1468_v5, %v1482_v20  ;;  %v1489_v26 = vsel %vm3558_vm11, %v1486_v53, %v1488_v24  ;;  %v1493_v29 = vsel %vm3558_vm11, %v1488_v24, %v1486_v53  ;;  %v3640_v50 = vsel %vm2419_vm15, 4294967295, %v3639_v50 }
  0xa4   : > { %v1494_v30 = vsel %vm2379_vm10, %v1489_v26, -inf  ;;  %v1495_v31 = vsel %vm2383_vm6, %v1493_v29, -inf  ;;  %vm2423_vm11 = vcmp.eq.s32.totalorder %v717_v39, 1  ;;  %v736_v53 = vrot.slane %v732_v42, %v2265_v15  ;;  %v1675_v42 = vld [vmem:[%s3537_s9] sm:$0xff] }
  0xa5   : > { %v1498_v33 = vcombine.low %v1494_v30, %v1495_v31  ;;  %v3642_v52 = vsel %vm2423_vm11, 4294967295, %v3641_v52  ;;  %v3643_v3 = vmov 0  ;;  %v3646_v4 = vmov 0 }
  0xa6   : > { %v1504_v40 = vpop.permute.xlu0 %1503  ;;  %vm3590_vm13 = vcmp.lt.s32.totalorder %v2232_v8, 18 }
  0xa7   : > { %v1500_v44 = vmax.f32 %v1484_v25, %v1498_v33  ;;  %v1505_v45 = vsel %vm3559_vm4, %v1502_v19, %v1504_v40  ;;  %v1509_v47 = vsel %vm3559_vm4, %v1504_v40, %v1502_v19  ;;  %vm2435_vm4 = vcmp.eq.s32.totalorder %v736_v53, 1  ;;  %v1334_v40 = vld [vmem:[%s3535_s7] sm:$0xff] }
  0xa8   : > { %v1510_v48 = vsel %vm2403_vm14, %v1505_v45, -inf  ;;  %v1511_v49 = vsel %vm2407_vm12, %v1509_v47, -inf  ;;  %v3644_v3 = vsel %vm2435_vm4, 4294967295, %v3643_v3  ;;  %vm2439_vm14 = vcmp.eq.s32.totalorder %v740_v54, 1 }
  0xa9   : > { %v1514_v51 = vcombine.low %v1510_v48, %v1511_v49  ;;  %3645 = vst [vmem:[#allocation2_spill] sm:$0xff] %v3644_v3  ;;  %v3647_v4 = vsel %vm2439_vm14, 4294967295, %v3646_v4  ;;  %v3658_v45 = vmov 0 }
  0xaa   : > { %v1520_v55 = vpop.permute.xlu0 %1519  ;;  %3648 = vst [vmem:[#allocation3_spill] sm:$0xff] %v3647_v4 }
  0xab   : > { %v1516_v56 = vmax.f32 %v1500_v44, %v1514_v51  ;;  %v1521_v57 = vsel %vm3563_vm8, %v1518_v41, %v1520_v55  ;;  %v1525_v58 = vsel %vm3563_vm8, %v1520_v55, %v1518_v41  ;;  %v778_v41 = vld [vmem:[%s3533_s5] sm:$0xff]  ;;  %vm365_vm8 = vcmp.lt.s32.totalorder %v2227_v7, 18 }
  0xac   : > { %v1526_v59 = vsel %vm2419_vm15, %v1521_v57, -inf  ;;  %v1527_v60 = vsel %vm2423_vm11, %v1525_v58, -inf  ;;  %vm3588_vm15 = vcmp.ge.s32.totalorder %v2232_v8, 2  ;;  %vm3652_vm11 = vcmp.lt.s32.totalorder %v2232_v8, 16 }
  0xad   : > { %v1530_v62 = vcombine.low %v1526_v59, %v1527_v60  ;;  %v3653_v44 = vmov 0  ;;  %v3678_v55 = vmov 0 }
  0xae   : > { %v1536_v5 = vpop.permute.xlu0 %1535 }
  0xaf   : > { %v1532_v6 = vmax.f32 %v1516_v56, %v1530_v62  ;;  %v1537_v10 = vsel %vm3562_vm7, %v1534_v61, %v1536_v5  ;;  %v1541_v11 = vsel %vm3562_vm7, %v1536_v5, %v1534_v61  ;;  %vm364_vm7 = vcmp.ge.s32.totalorder %v2227_v7, 2 }
  0xb0   : > { %v1542_v12 = vsel %vm2435_vm4, %v1537_v10, -inf  ;;  %v1543_v19 = vsel %vm2439_vm14, %v1541_v11, -inf  ;;  %vm3651_vm14 = vcmp.ge.s32.totalorder %v2232_v8, 0  ;;  %vm366_vm12 = vmand %vm364_vm7, %vm365_vm8  ;;  %vm3657_vm7 = vcmp.ge.s32.totalorder %v2232_v8, 4294967295 }
  0xb1   : > { %v1546_v20 = vcombine.low %v1542_v12, %v1543_v19  ;;  %vm407_vm4 = vmand %vm2267_vm3, %vm3651_vm14 }
  0xb2   : > { %vm2518_vm10 = vmand %vm407_vm4, %vm3652_vm11  ;;  %vm3591_vm4 = vcmp.lt.s32.totalorder %v2232_v8, 14 }
  0xb3   : > { %v2449_v21 = vmax.f32 %v1532_v6, %v1546_v20  ;;  %v3654_v44 = vsel %vm2518_vm10, 4294967295, %v3653_v44  ;;  %vm368_vm6 = vmand %vm366_vm12, %vm3588_vm15 }
  0xb4   : > { %vm3655_vm1 = vmmov %vm3651_vm14  ;;  %vm3656_vm14 = vcmp.ge.s32.totalorder %v2232_v8, 1 }
  0xb5   : > { %v2453_v22 = vcombine.high %v2449_v21, %v2449_v21  ;;  %vm376_vm2 = vmand %vm366_vm12, %vm3655_vm1  ;;  %vm3660_vm1 = vcmp.ge.s32.totalorder %v2232_v8, 2 }
  0xb6   : > { %vm372_vm8 = vmand %vm366_vm12, %vm3656_vm14 }
  0xb7   : > { %v1933_v23 = vpack.i.bf16 %v2449_v21, %v2453_v22  ;;  %v1948_v24 = vpack.i.bf16 %v2453_v22, %v2449_v21  ;;  %vm380_vm9 = vmand %vm366_vm12, %vm3657_vm7 }
  0xb8   : > { %vm384_vm11 = vmand %vm366_vm12, %vm3589_vm0  ;;  %vm3662_vm12 = vcmp.lt.s32.totalorder %v2232_v8, 17 }
  0xb9   : > { %1934 = vrot.lane.b32.xlu1 %v1933_v23, %s2088_s28  ;;  %1929 = vrot.lane.b32.xlu0 %v1933_v23, %s2085_s21  ;;  %vm2537_vm15 = vmand %vm368_vm6, %vm3590_vm13  ;;  %vm3665_vm6 = vcmp.lt.s32.totalorder %v2232_v8, 16 }
  0xba   : > { %v3659_v45 = vsel %vm2537_vm15, 4294967295, %v3658_v45  ;;  %vm390_vm10 = vmand %vm2237_vm5, %vm3660_vm1 }
  0xbb   : > { %vm3661_vm14 = vmmov %vm3660_vm1 }
  0xbc   : > { %vm403_vm7 = vmand %vm2267_vm3, %vm3661_vm14  ;;  %vm3670_vm14 = vcmp.lt.s32.totalorder %v2232_v8, 15 }
  0xbd   : > { %1939 = vrot.lane.b32.xlu1 %v1933_v23, %s2086_s22  ;;  %1944 = vrot.lane.b32.xlu0 %v1933_v23, %s2087_s27  ;;  %vm2551_vm0 = vmand %vm372_vm8, %vm3662_vm12  ;;  %vm3673_vm8 = vnez %v3654_v44 }
  0xbe   : > { %vm2557_vm13 = vmand %vm376_vm2, %vm3665_vm6  ;;  %v640_v53 = vsel %vm3673_vm8, 1, %v2083_v1  ;;  %vm3674_vm2 = vcmp.lt.s32.totalorder %v2232_v8, 18  ;;  %v2656_v10 = vsel %vm2551_vm0, 1, %v2083_v1  ;;  %vm3706_vm0 = vcmp.ge.s32.totalorder %v2232_v8, 4294967294 }
  0xbf   : > { %vm2563_vm1 = vmand %vm384_vm11, %vm3591_vm4  ;;  %vm3680_vm4 = vcmp.ge.s32.totalorder %v2232_v8, 4294967294  ;;  %v644_v56 = vrot.slane %v640_v53, %v2265_v15  ;;  %v648_v57 = vrot.slane %v640_v53, %v2271_v17  ;;  %v2661_v11 = vsel %vm2557_vm13, 1, %v2083_v1 }
  0xc0   : > { %vm2569_vm15 = vmand %vm380_vm9, %vm3670_vm14  ;;  %vm426_vm9 = vcmp.ge.s32.totalorder %v2227_v7, 4294967294  ;;  %vm427_vm14 = vcmp.lt.s32.totalorder %v2227_v7, 14  ;;  %v2678_v23 = vsel %vm2563_vm1, 1, %v2083_v1  ;;  %vm3712_vm1 = vcmp.lt.s32.totalorder %v2232_v8, 18 }
  0xc1   : > { %1949 = vrot.lane.b32.xlu1 %v1948_v24, %s2089_s29  ;;  %1954 = vrot.lane.b32.xlu0 %v1948_v24, %s2091_s11  ;;  %vm2578_vm12 = vmand %vm403_vm7, %vm3674_vm2  ;;  %v3802_v9 = vrot.slane %v2678_v23, %v2271_v17 }
  0xc2   : > { %vm3677_vm11 = vmmov %vm3674_vm2 }
  0xc3   : > { %vm2584_vm6 = vmand %vm390_vm10, %vm3677_vm11  ;;  %vm3684_vm11 = vcmp.lt.s32.totalorder %v2232_v8, 14 }
  0xc4   : > { %v3679_v55 = vsel %vm2584_vm6, 4294967295, %v3678_v55  ;;  %vm411_vm8 = vmand %vm2267_vm3, %vm3680_vm4 }
  0xc5   : > { %1959 = vrot.lane.b32.xlu1 %v1948_v24, %s2090_s30  ;;  %vm3681_vm7 = vmmov %vm3680_vm4 }
  0xc6   : > { %vm398_vm2 = vmand %vm2237_vm5, %vm3681_vm7  ;;  %vm2616_vm5 = vcmp.eq.s32.totalorder %v644_v56, 1  ;;  %vm3695_vm7 = vnez %v3659_v45 }
  0xc7   : > { %vm2600_vm10 = vmand %vm426_vm9, %vm427_vm14  ;;  %vm2620_vm9 = vcmp.eq.s32.totalorder %v648_v57, 1  ;;  %vm3694_vm14 = vcmp.ge.s32.totalorder %v2232_v8, 0  ;;  %v2633_v61 = vsel %vm3695_vm7, 1, %v2083_v1  ;;  %vm3703_vm7 = vcmp.lt.s32.totalorder %v2232_v8, 16 }
  0xc8   : > { %vm2606_vm6 = vmand %vm411_vm8, %vm3684_vm11 }
  0xc9   : > { %vm3687_vm3 = vmmov %vm3684_vm11  ;;  %vm3697_vm11 = vnez %v3614_v34  ;;  %v2780_v57 = vsel %vm2606_vm6, 1, %v2083_v1 }
  0xca   : > { %vm2612_vm4 = vmand %vm398_vm2, %vm3687_vm3  ;;  %vm3696_vm2 = vcmp.ge.s32.totalorder %v2232_v8, 2 }
  0xcb   : > { %v3689_v16 = vsel %vm2612_vm4, 4294967295, %v3688_v16  ;;  %vm433_vm8 = vmand %vm2600_vm10, %vm3694_vm14 }
  0xcc   : > { %vm2639_vm3 = vmand %vm3697_vm11, %vm3696_vm2 }
  0xcd   : > { %vm3700_vm4 = vmmov %vm3696_vm2 }
  0xce   : > { %vm2647_vm14 = vmand %vm2600_vm10, %vm3700_vm4 }
  0xcf   : > { %vm2665_vm2 = vmand %vm433_vm8, %vm3703_vm7 }
  0xd0   : > { %vm2693_vm13 = vmand %vm3697_vm11, %vm3706_vm0  ;;  %vm3718_vm11 = vcmp.lt.s32.totalorder %v2232_v8, 14  ;;  %v2798_v7 = vsel %vm2665_vm2, 1, %v2083_v1 }
  0xd1   : > { %vm3715_vm4 = vmmov %vm3712_vm1 }
  0xd2   : > { %vm2737_vm8 = vmand %vm2639_vm3, %vm3715_vm4  ;;  %vm3730_vm4 = vcmask 7168  }
  0xd3   : > { %vm2755_vm3 = vmand %vm2693_vm13, %vm3718_vm11  ;;  %vm3725_vm13 = vcmp.ge.s32.totalorder %v2232_v8, 1 }
  0xd4   : > { %v2815_v12 = vsel %vm2755_vm3, 1, %v2083_v1  ;;  %vm3726_vm6 = vmmov %vm3718_vm11 }
  0xd5   : > { %vm3732_vm3 = vmmov %vm3730_vm4 }
  0xea   : > { %v2466_v25 = vpop.f32.mrb[0].mxu1 }
  0xeb   : > { %3649 = vst [vmem:[#allocation4_spill] sm:$0xff] %v2466_v25  ;;  %v2468_v26 = vpop.f32.mrb[1].mxu1 }
  0xec   : > { %3650 = vst [vmem:[#allocation5_spill] sm:$0xff] %v2468_v26 }
  0xee   : > { %v539_v29 = vpop.f32.mrb[2].mxu1 }
  0xef   : > { %v2471_v30 = vadd.f32 %v539_v29, %v2275_v18  ;;  %v541_v31 = vpop.f32.mrb[3].mxu1  ;;  %v2685_v29 = vsel %vm2569_vm15, 1, %v2083_v1  ;;  %vm3709_vm15 = vnez %v3679_v55 }
  0xf0   : > { %v2474_v32 = vadd.f32 %v541_v31, %v2275_v18  ;;  %v441_v18 = vld [vmem:[%s3531_s3] sm:$0xff] }
  0xf1   : > { %722 = vrot.lane.b32.xlu0 %v2471_v30, %s2092_s12  ;;  %v2715_v34 = vsel %vm2616_vm5, %v2471_v30, 0.0 }
  0xf2   : > { %v1963_v33 = vpack.i.bf16 %v2471_v30, %v2474_v32  ;;  %v2018_v39 = vpack.i.bf16 %v2474_v32, %v2471_v30  ;;  %3711 = vst [vmem:[#allocation7_spill] sm:$0xff] %v2715_v34 }
  0xf4   : > { %1964 = vrot.lane.b32.xlu1 %v1963_v33, %s2093_s19 }
  0xf5   : > { %1969 = vrot.lane.b32.xlu0 %v1963_v33, %s2094_s20 }
  0xf8   : > { %1974 = vrot.lane.b32.xlu1 %v1963_v33, %s2095_s23 }
  0xf9   : > { %1979 = vrot.lane.b32.xlu0 %v1963_v33, %s2096_s24 }
  0xfc   : > { %1984 = vrot.lane.b32.xlu1 %v1963_v33, %s2086_s22  ;;  %s2101_s22 = smov 126  }
  0xfd   : > { %1989 = vrot.lane.b32.xlu0 %v1963_v33, %s2097_s25 }
 0x100   : > { %1994 = vrot.lane.b32.xlu1 %v1963_v33, %s2085_s21  ;;  %s2103_s21 = smov 110  }
 0x101   : > { %1999 = vrot.lane.b32.xlu0 %v1963_v33, %s2088_s28  ;;  %s2105_s28 = smov 98  }
 0x104   : > { %2004 = vrot.lane.b32.xlu1 %v1963_v33, %s2098_s26 }
 0x105   : > { %2009 = vrot.lane.b32.xlu0 %v1963_v33, %s2087_s27  ;;  %s2104_s27 = smov 96  }
 0x108   : > { %2014 = vrot.lane.b32.xlu1 %v1963_v33, %s2099_s15 }
 0x109   : > { %2019 = vrot.lane.b32.xlu0 %v2018_v39, %s2089_s29  ;;  %s2106_s29 = smov 95  }
 0x10c   : > { %2024 = vrot.lane.b32.xlu1 %v2018_v39, %s2091_s11  ;;  %s2107_s11 = smov 97  }
 0x10d   : > { %2029 = vrot.lane.b32.xlu0 %v1963_v33, %s2100_s16 }
 0x110   : > { %2034 = vrot.lane.b32.xlu1 %v2018_v39, %s2090_s30 }
 0x111   : > { %2039 = vrot.lane.b32.xlu0 %v2018_v39, %s2101_s22 }
 0x114   : > { %2044 = vrot.lane.b32.xlu1 %v2018_v39, %s2102_s17 }
 0x115   : > { %2049 = vrot.lane.b32.xlu0 %v2018_v39, %s2103_s21 }
 0x118   : > { %724 = vrot.lane.b32.xlu1 %v2474_v32, %s2092_s12 }
 0x119   : > { %2059 = vrot.lane.b32.xlu0 %v2018_v39, %s2104_s27 }
 0x11c   : > { %2054 = vrot.lane.b32.xlu1 %v2018_v39, %s2105_s28  ;;  %s1852_s28 = sshll.u32 %s3969_s14, 6 }
 0x11d   : > { %2069 = vrot.lane.b32.xlu0 %v2018_v39, %s2106_s29 }
 0x120   : > { %2064 = vrot.lane.b32.xlu1 %v2018_v39, %s2107_s11  ;;  %v2700_v39 = vsel %vm2578_vm12, 1, %v2083_v1  ;;  %vm2721_vm12 = vmand %vm2647_vm14, %vm3712_vm1  ;;  %vm3729_vm1 = vcmp.lt.s32.totalorder %v2232_v8, 17 }
 0x121   : > { %1212 = vrot.lane.b32.xlu0 %v2471_v30, %s2108_s18  ;;  %vm3721_vm14 = vmmov %vm3706_vm0  ;;  %vm3724_vm0 = vnez %v3689_v16  ;;  %v2803_v16 = vsel %vm2721_vm12, 1, %v2083_v1 }
 0x122   : > { %vm2769_vm7 = vmand %vm2600_vm10, %vm3721_vm14  ;;  %v2785_v62 = vsel %vm3724_vm0, 1, %v2083_v1  ;;  %vm3733_vm14 = vcmask 130048   ;;  %vm3738_vm0 = vcmp.lt.s32.totalorder %v2232_v8, 15 }
 0x123   : > { %vm2821_vm2 = vmand %vm2769_vm7, %vm3726_vm6  ;;  %vm3740_vm6 = vnez %v3610_v27 }
 0x124   : > { %1214 = vrot.lane.b32.xlu1 %v2474_v32, %s2108_s18  ;;  %v2859_v58 = vsel %vm2821_vm2, 1, %v2083_v1  ;;  %vm3737_vm7 = vmmov %vm3733_vm14  ;;  %vm3741_vm2 = vnez %v3612_v28  ;;  %s3515_s18 = scalar_lea.vmem %s3538_s10, %s1852_s28 }
 0x125   : > { %1631 = vrot.lane.b32.xlu0 %v2449_v21, %s2092_s12  ;;  %3734 = vst [vmem:[#allocation8_spill] sm:$0xff] %v2859_v58 }
 0x128   : > { %1633 = vrot.lane.b32.xlu1 %v2453_v22, %s2092_s12 }
 0x129   : > { %445 = vperm.xlu0 %1927, %v441_v18   ;;  %v2705_v18 = vsel %vm3709_vm15, 1, %v2083_v1  ;;  %vm431_vm15 = vmand %vm2600_vm10, %vm3725_vm13 }
 0x12a   : > { %vm432_vm12 = vmand %vm431_vm15, %vm3729_vm1  ;;  %vm3739_vm15 = vnez %v3627_v0  ;;  %vm3742_vm1 = vcmask 1039360  }
 0x12b   : > { %v2628_v60 = vpop.permute.xlu1 %1934  ;;  %v2651_v6 = vpop.permute.xlu0 %1929  ;;  %v2862_v54 = vsel %vm432_vm12, 1, %v2083_v1  ;;  %vm3764_vm12 = vnez %v3620_v43 }
 0x12c   : > { %781 = vperm.xlu1 %2073, %v778_v41   ;;  %v1937_v33 = vunpack.i.h.bf16 %v2628_v60  ;;  %v1936_v2 = vunpack.i.l.bf16 %v2628_v60  ;;  %v1932_v49 = vunpack.i.h.bf16 %v2651_v6  ;;  %v1931_v48 = vunpack.i.l.bf16 %v2651_v6  ;;  %3735 = vst [vmem:[#allocation9_spill] sm:$0xff] %v2862_v54 }
 0x12d   : > { %1337 = vperm.xlu0 %1927, %v1334_v40   ;;  %v2710_v40 = vsel %vm2620_vm9, %v2474_v32, 0.0  ;;  %v2810_v60 = vsel %vm2737_vm8, 1, %v2083_v1  ;;  %vm3731_vm8 = vcmp.ge.s32.totalorder %v2232_v8, 4294967295 }
 0x12e   : > { %3710 = vst [vmem:[#allocation6_spill] sm:$0xff] %v2710_v40  ;;  %v1592_v5 = vsel %vm3730_vm4, %v1936_v2, %v1937_v33  ;;  %vm435_vm11 = vmand %vm2600_vm10, %vm3731_vm8  ;;  %v1589_v53 = vsel %vm3732_vm3, %v1937_v33, %v1936_v2  ;;  %v1567_v45 = vsel %vm3733_vm14, %v1932_v49, %v1931_v48  ;;  %vm3736_vm10 = vnez %v3625_v63 }
 0x12f   : > { %v2741_v47 = vpop.permute.xlu1 %1939  ;;  %v2775_v55 = vpop.permute.xlu0 %1944  ;;  %v1593_v56 = vsel %vm3736_vm10, %v1592_v5, 0.0  ;;  %v1570_v19 = vsel %vm3737_vm7, %v1931_v48, %v1932_v49  ;;  %vm436_vm13 = vmand %vm435_vm11, %vm3738_vm0  ;;  %v1594_v8 = vsel %vm3739_vm15, %v1589_v53, 0.0  ;;  %v1572_v48 = vsel %vm3741_vm2, %v1567_v45, 0.0 }
 0x130   : > { %1678 = vperm.xlu1 %2073, %v1675_v42   ;;  %v1942_v2 = vunpack.i.h.bf16 %v2741_v47  ;;  %v1941_v33 = vunpack.i.l.bf16 %v2741_v47  ;;  %v1947_v41 = vunpack.i.h.bf16 %v2775_v55  ;;  %v1946_v30 = vunpack.i.l.bf16 %v2775_v55  ;;  %vm3746_vm3 = vmmov %vm3742_vm1 }
 0x131   : > { %v2884_v55 = vsel %vm436_vm13, 1, %v2083_v1  ;;  %v1571_v5 = vsel %vm3740_vm6, %v1570_v19, 0.0  ;;  %vm3743_vm4 = vcmask 138240   ;;  %vm3745_vm11 = vcmask 121856  }
 0x132   : > { %v1556_v53 = vsel %vm3743_vm4, %v1942_v2, %v1941_v33  ;;  %vm3744_vm8 = vmmov %vm3743_vm4  ;;  %v1578_v24 = vsel %vm3745_vm11, %v1947_v41, %v1946_v30  ;;  %v3747_v1 = vrot.slane %v2633_v61, %v2271_v17  ;;  %vm3751_vm13 = vcmask 916480  }
 0x133   : > { %v1950_v20 = vpop.permute.xlu1 %1949  ;;  %v1955_v44 = vpop.permute.xlu0 %1954  ;;  %v1559_v49 = vsel %vm3744_vm8, %v1941_v33, %v1942_v2  ;;  %vm3750_vm0 = vmmov %vm3745_vm11  ;;  %v3752_v2 = vrot.slane %v2661_v11, %v2271_v17  ;;  %vm3755_vm4 = vnez %v3632_v14  ;;  %vm3762_vm14 = vnez %v3622_v46 }
 0x134   : > { %v1952_v51 = vunpack.i.h.bf16 %v1950_v20  ;;  %v1951_v6 = vunpack.i.l.bf16 %v1950_v20  ;;  %v1957_v42 = vunpack.i.h.bf16 %v1955_v44  ;;  %v1956_v31 = vunpack.i.l.bf16 %v1955_v44  ;;  %vm3756_vm8 = vmmov %vm3751_vm13 }
 0x135   : > { %v1650_v44 = vrot.slane %v1593_v56, 4  ;;  %vm2898_vm7 = vcmp.eq.s32.totalorder %v3747_v1, 1  ;;  %v1581_v56 = vsel %vm3750_vm0, %v1946_v30, %v1947_v41  ;;  %v3757_v30 = vrot.slane %v2633_v61, %v2265_v15 }
 0x136   : > { %v1606_v32 = vsel %vm3742_vm1, %v1952_v51, %v1951_v6  ;;  %v1602_v47 = vsel %vm3746_vm3, %v1951_v6, %v1952_v51  ;;  %v1628_v45 = vsel %vm3751_vm13, %v1957_v42, %v1956_v31  ;;  %vm2907_vm1 = vcmp.eq.s32.totalorder %v3752_v2, 1 }
 0x137   : > { %v1960_v20 = vpop.permute.xlu1 %1959  ;;  %v1651_v51 = vrot.slane %v1594_v8, 4  ;;  %v1645_v6 = vrot.slane %v1572_v48, 4  ;;  %v1608_v1 = vsel %vm3755_vm4, %v1606_v32, 0.0  ;;  %v1624_v58 = vsel %vm3756_vm8, %v1956_v31, %v1957_v42 }
 0x138   : > { %v1962_v26 = vunpack.i.h.bf16 %v1960_v20  ;;  %v1961_v25 = vunpack.i.l.bf16 %v1960_v20  ;;  %vm2917_vm11 = vcmp.eq.s32.totalorder %v3757_v30, 1  ;;  %v1644_v20 = vrot.slane %v1571_v5, 4 }
 0x139   : > { %vm3760_vm3 = vnez %v3630_v13  ;;  %vm3761_vm13 = vnez %v3618_v36  ;;  %v1583_v32 = vsel %vm3762_vm14, %v1578_v24, 0.0  ;;  %vm3763_vm8 = vnez %v3616_v35 }
 0x13a   : > { %v1607_v2 = vsel %vm3760_vm3, %v1602_v47, 0.0  ;;  %v1561_v48 = vsel %vm3761_vm13, %v1556_v53, 0.0  ;;  %v1560_v31 = vsel %vm3763_vm8, %v1559_v49, 0.0  ;;  %v1582_v61 = vsel %vm3764_vm12, %v1581_v56, 0.0 }
 0x13b   : > { %vm3765_vm6 = vnez %v3642_v52  ;;  %v3766_v8 = vrot.slane %v2656_v10, %v2271_v17  ;;  %v3769_v24 = vrot.slane %v2661_v11, %v2265_v15  ;;  %v1657_v56 = vrot.slane %v1608_v1, 4 }
 0x13c   : > { %v1630_v42 = vsel %vm3765_vm6, %v1628_v45, 0.0  ;;  %vm3772_vm6 = vnez %v3640_v50  ;;  %vm3773_vm3 = vcmask 924672   ;;  %v3777_v53 = vrot.slane %v2656_v10, %v2265_v15 }
 0x13d   : > { %vm2938_vm0 = vcmp.eq.s32.totalorder %v3766_v8, 1  ;;  %vm2945_vm14 = vcmp.eq.s32.totalorder %v3769_v24, 1  ;;  %v1629_v45 = vsel %vm3772_vm6, %v1624_v58, 0.0  ;;  %v1617_v30 = vsel %vm3773_vm3, %v1962_v26, %v1961_v25 }
 0x13e   : > { %v3774_v8 = vrot.slane %v2685_v29, %v2271_v17  ;;  %v1656_v24 = vrot.slane %v1607_v2, 4  ;;  %vm2966_vm12 = vcmp.eq.s32.totalorder %v3777_v53, 1  ;;  %vm3780_vm6 = vcmask 1043456  }
 0x13f   : > { %v2971_v58 = vsel %vm3780_vm6, %v1561_v48, %v1645_v6  ;;  %vm3781_vm3 = vmmov %vm3780_vm6  ;;  %v1663_v40 = vrot.slane %v1630_v42, 4  ;;  %vm3782_vm2 = vcmask 924672   ;;  %v1662_v53 = vrot.slane %v1629_v45, 4 }
 0x140   : > { %vm2957_vm4 = vcmp.eq.s32.totalorder %v3774_v8, 1  ;;  %v2974_v54 = vsel %vm3781_vm3, %v1583_v32, %v1651_v51  ;;  %v1203_v8 = vrot.slane %v2884_v55, %v2265_v15  ;;  %v1613_v11 = vsel %vm3782_vm2, %v1961_v25, %v1962_v26  ;;  %vm3783_vm15 = vmmov %vm3781_vm3 }
 0x141   : > { %v2980_v4 = vsel %vm3783_vm15, %v1560_v31, %v1644_v20  ;;  %vm3784_vm10 = vmmov %vm3781_vm3  ;;  %v3785_v51 = vrot.slane %v2685_v29, %v2265_v15  ;;  %v3786_v32 = vmov 0  ;;  %vm3788_vm2 = vnez %v3638_v38  ;;  %v3906_v38 = vld [vmem:[#allocation6_spill] sm:$0xff] }
 0x142   : > { %v2983_v10 = vsel %vm3784_vm10, %v1582_v61, %v1650_v44  ;;  %v1619_v25 = vsel %vm3788_vm2, %v1617_v30, 0.0  ;;  %v1885_v44 = vpack.c.bf16 %v2974_v54, %v2971_v58  ;;  %v3789_v31 = vsel %vm2620_vm9, %v2453_v22, 0.0  ;;  %vm3790_vm10 = vmmov %vm3781_vm3 }
 0x143   : > { %vm2988_vm6 = vcmp.eq.s32.totalorder %v3785_v51, 1  ;;  %v3001_v61 = vsel %vm3790_vm10, %v3789_v31, %v1657_v56  ;;  %vm3791_vm3 = vnez %v3636_v37  ;;  %vm3794_vm15 = vcmask 261120   ;;  %vm3795_vm9 = vmmov %vm3790_vm10 }
 0x144   : > { %v3787_v32 = vsel %vm2988_vm6, 4294967295, %v3786_v32  ;;  %v1618_v29 = vsel %vm3791_vm3, %v1613_v11, 0.0  ;;  %vm3792_vm6 = vcmask 277504   ;;  %v3013_v22 = vsel %vm3795_vm9, %v1619_v25, %v1663_v40  ;;  %vm3797_vm10 = vmmov %vm3795_vm9 }
 0x145   : > { %vm3793_vm13 = vmmov %vm3792_vm6  ;;  %v3796_v56 = vsel %vm2616_vm5, %v2449_v21, 0.0  ;;  %v3799_v30 = vrot.slane %v2678_v23, %v2265_v15  ;;  %v3811_v47 = vrot.slane %v2705_v18, %v2271_v17  ;;  %v1889_v1 = vpack.c.bf16 %v3013_v22, %v3001_v61 }
 0x146   : > { %v3020_v11 = vsel %vm3797_vm10, %v3796_v56, %v1656_v24  ;;  %vm3805_vm5 = vmmov %vm3795_vm9  ;;  %vm3808_vm10 = vcmask 252928  }
 0x163   : > { %v2933_v5 = vpop.permute.xlu0 %722 }
 0x166   : > { %v1965_v2 = vpop.permute.xlu1 %1964 }
 0x167   : > { %v1967_v3 = vunpack.i.h.bf16 %v1965_v2  ;;  %v1966_v6 = vunpack.i.l.bf16 %v1965_v2  ;;  %v1970_v48 = vpop.permute.xlu0 %1969 }
 0x168   : > { %v1972_v26 = vunpack.i.h.bf16 %v1970_v48  ;;  %v1971_v20 = vunpack.i.l.bf16 %v1970_v48 }
 0x169   : > { %v873_v42 = vsel %vm3792_vm6, %v1967_v3, %v1966_v6  ;;  %v876_v45 = vsel %vm3793_vm13, %v1966_v6, %v1967_v3  ;;  %vm3798_vm13 = vmmov %vm3794_vm15  ;;  %vm3026_vm6 = vcmp.eq.s32.totalorder %v3799_v30, 1 }
 0x16a   : > { %v919_v2 = vsel %vm3794_vm15, %v1972_v26, %v1971_v20  ;;  %v1975_v48 = vpop.permute.xlu1 %1974  ;;  %v889_v59 = vsel %vm2898_vm7, %v873_v42, 0.0  ;;  %v922_v3 = vsel %vm3798_vm13, %v1971_v20, %v1972_v26  ;;  %vm3033_vm7 = vcmp.eq.s32.totalorder %v3802_v9, 1  ;;  %vm3810_vm13 = vmmov %vm3805_vm5 }
 0x16b   : > { %v1977_v6 = vunpack.i.h.bf16 %v1975_v48  ;;  %v1976_v51 = vunpack.i.l.bf16 %v1975_v48  ;;  %v1980_v31 = vpop.permute.xlu0 %1979  ;;  %v935_v40 = vsel %vm2907_vm1, %v919_v2, 0.0  ;;  %v888_v26 = vsel %vm2917_vm11, %v876_v45, 0.0  ;;  %vm3809_vm1 = vmmov %vm3808_vm10 }
 0x16c   : > { %v1982_v24 = vunpack.i.h.bf16 %v1980_v31  ;;  %v1981_v25 = vunpack.i.l.bf16 %v1980_v31  ;;  %v3042_v20 = vsel %vm3805_vm5, %v1618_v29, %v1662_v53  ;;  %vm3806_vm15 = vcmask 269312  }
 0x16d   : > { %v896_v42 = vsel %vm3806_vm15, %v1977_v6, %v1976_v51  ;;  %v1238_v30 = vrot.slane %v889_v59, 4  ;;  %v1244_v48 = vrot.slane %v935_v40, 4  ;;  %vm3807_vm9 = vmmov %vm3806_vm15  ;;  %v934_v2 = vsel %vm2945_vm14, %v922_v3, 0.0 }
 0x16e   : > { %v899_v23 = vsel %vm3807_vm9, %v1976_v51, %v1977_v6  ;;  %v1985_v56 = vpop.permute.xlu1 %1984  ;;  %v912_v9 = vsel %vm2938_vm0, %v896_v42, 0.0  ;;  %v942_v33 = vsel %vm3808_vm10, %v1982_v24, %v1981_v25  ;;  %v945_v41 = vsel %vm3809_vm1, %v1981_v25, %v1982_v24  ;;  %vm3814_vm14 = vmmov %vm3805_vm5 }
 0x16f   : > { %vm987_vm11 = vcmask 146432   ;;  %v1987_v53 = vunpack.i.h.bf16 %v1985_v56  ;;  %v1986_v29 = vunpack.i.l.bf16 %v1985_v56  ;;  %v1990_v45 = vpop.permute.xlu0 %1989  ;;  %v958_v59 = vsel %vm2957_vm4, %v942_v33, 0.0 }
 0x170   : > { %v1284_v6 = vsel %vm3810_vm13, %v1238_v30, %v912_v9  ;;  %vm3058_vm0 = vcmp.eq.s32.totalorder %v3811_v47, 1  ;;  %v1992_v49 = vunpack.i.h.bf16 %v1990_v45  ;;  %v1991_v3 = vunpack.i.l.bf16 %v1990_v45 }
 0x171   : > { %v1286_v31 = vsel %vm3814_vm14, %v1244_v48, %v958_v59  ;;  %v911_v40 = vsel %vm2966_vm12, %v899_v23, 0.0  ;;  %vm3815_vm5 = vcmask 138240   ;;  %v1237_v42 = vrot.slane %v888_v26, 4 }
 0x172   : > { %v554_v24 = vsel %vm3815_vm5, %v1987_v53, %v1986_v29  ;;  %vm3816_vm15 = vmmov %vm3815_vm5  ;;  %v1861_v25 = vpack.c.bf16 %v1286_v31, %v1284_v6  ;;  %vm3817_vm4 = vnez %v3618_v36  ;;  %v1995_v9 = vpop.permute.xlu1 %1994  ;;  %vm3818_vm9 = vnez %v3787_v32 }
 0x173   : > { %v557_v34 = vsel %vm3816_vm15, %v1986_v29, %v1987_v53  ;;  %v3073_v56 = vsel %vm3817_vm4, %v554_v24, 0.0  ;;  %v957_v48 = vsel %vm3818_vm9, %v945_v41, 0.0  ;;  %vm1033_vm10 = vcmask 15360   ;;  %v2000_v33 = vpop.permute.xlu0 %1999 }
 0x174   : > { %v3069_v30 = vsel %vm3763_vm8, %v557_v34, 0.0  ;;  %vm3819_vm12 = vcmask 244736   ;;  %1862 = vmatprep.subr.bf16.mxu0 %v1861_v25  ;;  %v1243_v35 = vrot.slane %v934_v2, 4  ;;  %vm3821_vm8 = vmmov %vm3810_vm13  ;;  %v3822_v36 = vrot.slane %v2700_v39, %v2265_v15 }
 0x175   : > { %v965_v23 = vsel %vm3819_vm12, %v1992_v49, %v1991_v3  ;;  %vm3820_vm1 = vmmov %vm3819_vm12  ;;  %v1283_v53 = vsel %vm3821_vm8, %v1237_v42, %v911_v40  ;;  %v3825_v32 = vrot.slane %v2700_v39, %v2271_v17  ;;  %v1255_v45 = vrot.slane %v3069_v30, 4 }
 0x176   : > { %v968_v26 = vsel %vm3820_vm1, %v1991_v3, %v1992_v49  ;;  %vm3085_vm13 = vcmp.eq.s32.totalorder %v3822_v36, 1  ;;  %v1997_v59 = vunpack.i.h.bf16 %v1995_v9  ;;  %v1996_v2 = vunpack.i.l.bf16 %v1995_v9  ;;  %vm3828_vm5 = vmmov %vm3821_vm8  ;;  %v2005_v25 = vpop.permute.xlu1 %2004 }
 0x177   : > { %vm3092_vm14 = vcmp.eq.s32.totalorder %v3825_v32, 1  ;;  %v1256_v47 = vrot.slane %v3073_v56, 4  ;;  %v2002_v49 = vunpack.i.h.bf16 %v2000_v33  ;;  %v2001_v3 = vunpack.i.l.bf16 %v2000_v33  ;;  %v2010_v6 = vpop.permute.xlu0 %2009 }
 0x178   : > { %v1285_v31 = vsel %vm3828_vm5, %v1243_v35, %v957_v48  ;;  %v980_v39 = vsel %vm3026_vm6, %v968_v26, 0.0  ;;  %v981_v40 = vsel %vm3033_vm7, %v965_v23, 0.0  ;;  %vm3829_vm15 = vcmask 130048  }
 0x179   : > { %v577_v24 = vsel %vm3829_vm15, %v1997_v59, %v1996_v2  ;;  %v1863_v34 = vpack.c.bf16 %v1285_v31, %v1283_v53  ;;  %vm3830_vm4 = vcmask 7168   ;;  %v2007_v36 = vunpack.i.h.bf16 %v2005_v25  ;;  %vm3834_vm7 = vmmov %vm3829_vm15 }
 0x17a   : > { %v623_v42 = vsel %vm3830_vm4, %v2002_v49, %v2001_v3  ;;  %vm3831_vm9 = vmmov %vm3830_vm4  ;;  %v2006_v32 = vunpack.i.l.bf16 %v2005_v25  ;;  %vm3832_vm12 = vnez %v3625_v63  ;;  %vm3833_vm6 = vnez %v3627_v0 }
 0x17b   : > { %v626_v9 = vsel %vm3831_vm9, %v2001_v3, %v2002_v49  ;;  %v3114_v19 = vsel %vm3833_vm6, %v623_v42, 0.0  ;;  %1864 = vmatpush1.bf16.msra.mxu0 %v1863_v34  ;;  %v2012_v21 = vunpack.i.h.bf16 %v2010_v6  ;;  %v2011_v23 = vunpack.i.l.bf16 %v2010_v6  ;;  %v2015_v3 = vpop.permute.xlu1 %2014  ;;  %v2020_v25 = vpop.permute.xlu0 %2019 }
 0x17c   : > { %v3110_v48 = vsel %vm3832_vm12, %v626_v9, 0.0  ;;  %v3116_v26 = vrot.slane %v980_v39, 4  ;;  %v1250_v33 = vrot.slane %v981_v40, 4  ;;  %v580_v35 = vsel %vm3834_vm7, %v1996_v2, %v1997_v59 }
 0x17d   : > { %v988_v53 = vsel %vm987_vm11, %v2007_v36, %v2006_v32  ;;  %vm1010_vm1 = vcmask 113664   ;;  %v753_v49 = vrot.slane %v3110_v48, 4  ;;  %vm3835_vm8 = vcmask 121856  }
 0x17e   : > { %v603_v63 = vsel %vm3835_vm8, %v2011_v23, %v2012_v21  ;;  %vm3836_vm5 = vnez %v3612_v28  ;;  %v1004_v31 = vsel %vm3058_vm0, %v988_v53, 0.0  ;;  %v3837_v6 = vrot.slane %v2705_v18, %v2265_v15  ;;  %vm3840_vm4 = vmmov %vm3835_vm8 }
 0x17f   : > { %v593_v0 = vsel %vm3836_vm5, %v577_v24, 0.0  ;;  %v754_v59 = vrot.slane %v3114_v19, 4  ;;  %v991_v2 = vsel %vm987_vm11, %v2006_v32, %v2007_v36  ;;  %v2017_v40 = vunpack.i.h.bf16 %v2015_v3 }
 0x180   : > { %vm3129_vm15 = vcmp.eq.s32.totalorder %v3837_v6, 1  ;;  %v2016_v34 = vunpack.i.l.bf16 %v2015_v3  ;;  %v600_v28 = vsel %vm3840_vm4, %v2012_v21, %v2011_v23  ;;  %vm3841_vm9 = vnez %v3620_v43  ;;  %v2025_v23 = vpop.permute.xlu1 %2024 }
 0x181   : > { %v3138_v51 = vsel %vm3841_vm9, %v603_v63, 0.0  ;;  %v2022_v24 = vunpack.i.h.bf16 %v2020_v25  ;;  %v2021_v42 = vunpack.i.l.bf16 %v2020_v25  ;;  %v748_v53 = vrot.slane %v593_v0, 4 }
 0x182   : > { %v1034_v18 = vsel %vm1033_vm10, %v2017_v40, %v2016_v34  ;;  %v1037_v9 = vsel %vm1033_vm10, %v2016_v34, %v2017_v40  ;;  %vm3842_vm0 = vcmask 1043456   ;;  %vm3843_vm11 = vcmask 1039360  }
 0x183   : > { %v1288_v6 = vsel %vm3842_vm0, %v1250_v33, %v1004_v31  ;;  %v1049_v36 = vsel %vm3085_vm13, %v1037_v9, 0.0  ;;  %v1050_v32 = vsel %vm3092_vm14, %v1034_v18, 0.0  ;;  %v658_v21 = vsel %vm3843_vm11, %v2021_v42, %v2022_v24  ;;  %vm3844_vm12 = vmmov %vm3843_vm11  ;;  %v2030_v31 = vpop.permute.xlu0 %2029 }
 0x184   : > { %v662_v43 = vsel %vm3844_vm12, %v2022_v24, %v2021_v42  ;;  %vm1055_vm6 = vcmask 1031168   ;;  %v1261_v63 = vrot.slane %v3138_v51, 4  ;;  %vm3845_vm7 = vnez %v3630_v13  ;;  %vm3846_vm10 = vmmov %vm3842_vm0 }
 0x185   : > { %v3152_v3 = vsel %vm3845_vm7, %v658_v21, 0.0  ;;  %v1290_v33 = vsel %vm3846_vm10, %v1256_v47, %v593_v0  ;;  %vm3847_vm13 = vnez %v3622_v46  ;;  %v3848_v41 = vrot.slane %v2780_v57, %v2265_v15  ;;  %vm3863_vm7 = vmmov %vm3846_vm10 }
 0x186   : > { %v3157_v29 = vsel %vm3847_vm13, %v600_v28, 0.0  ;;  %v3851_v34 = vrot.slane %v2780_v57, %v2271_v17  ;;  %v3173_v47 = vrot.slane %v1049_v36, 4  ;;  %vm3854_vm5 = vnez %v3632_v14  ;;  %vm3865_vm13 = vmmov %vm3863_vm7 }
 0x187   : > { %vm3162_vm14 = vcmp.eq.s32.totalorder %v3848_v41, 1  ;;  %v3177_v46 = vsel %vm3854_vm5, %v662_v43, 0.0  ;;  %v2027_v0 = vunpack.i.h.bf16 %v2025_v23  ;;  %v2026_v25 = vunpack.i.l.bf16 %v2025_v23  ;;  %v2035_v23 = vpop.permute.xlu1 %2034 }
 0x188   : > { %vm3169_vm8 = vcmp.eq.s32.totalorder %v3851_v34, 1  ;;  %vm1078_vm4 = vcmask 932864   ;;  %v3179_v28 = vrot.slane %v1050_v32, 4  ;;  %v1865_v24 = vpack.c.bf16 %v1290_v33, %v1288_v6  ;;  %v2040_v34 = vpop.permute.xlu0 %2039 }
 0x189   : > { %v2032_v42 = vunpack.i.h.bf16 %v2030_v31  ;;  %v2031_v18 = vunpack.i.l.bf16 %v2030_v31  ;;  %v3855_v57 = vrot.slane %v2785_v62, %v2271_v17  ;;  %v3858_v14 = vrot.slane %v2785_v62, %v2265_v15 }
 0x18a   : > { %v759_v32 = vrot.slane %v3152_v3, 4  ;;  %vm3861_vm11 = vcmask 916480   ;;  %v772_v43 = vsel %vm3863_vm7, %v3157_v29, %v754_v59  ;;  %v760_v33 = vrot.slane %v3177_v46, 4  ;;  %1866 = vmatprep.subr.bf16.mxu0 %v1865_v24 }
 0x18b   : > { %vm3184_vm9 = vcmp.eq.s32.totalorder %v3855_v57, 1  ;;  %vm3191_vm0 = vcmp.eq.s32.totalorder %v3858_v14, 1  ;;  %v704_v6 = vsel %vm3861_vm11, %v2026_v25, %v2027_v0  ;;  %vm3862_vm12 = vmmov %vm3861_vm11  ;;  %vm3864_vm10 = vnez %v3640_v50  ;;  %v2045_v14 = vpop.permute.xlu1 %2044 }
 0x18c   : > { %v708_v21 = vsel %vm3862_vm12, %v2027_v0, %v2026_v25  ;;  %v3203_v31 = vsel %vm3864_vm10, %v704_v6, 0.0  ;;  %v770_v62 = vsel %vm3865_vm13, %v3073_v56, %v748_v53  ;;  %v1262_v41 = vrot.slane %v3157_v29, 4  ;;  %vm3868_vm10 = vmmov %vm3863_vm7 }
 0x18d   : > { %vm3866_vm5 = vnez %v3642_v52  ;;  %v1011_v59 = vsel %vm1010_vm1, %v2032_v42, %v2031_v18  ;;  %v1853_v25 = vpack.c.bf16 %v772_v43, %v770_v62  ;;  %vm3867_vm11 = vnez %v3610_v27  ;;  %vm3869_vm13 = vmmov %vm3863_vm7 }
 0x18e   : > { %v3210_v0 = vsel %vm3866_vm5, %v708_v21, 0.0  ;;  %v592_v57 = vsel %vm3867_vm11, %v580_v35, 0.0  ;;  %vm1101_vm12 = vcmask 900096   ;;  %v1003_v24 = vsel %vm3129_vm15, %v991_v2, 0.0  ;;  %vm3870_vm15 = vmmov %vm3863_vm7 }
 0x18f   : > { %v747_v50 = vrot.slane %v592_v57, 4  ;;  %v1289_v56 = vsel %vm3863_vm7, %v1255_v45, %v592_v57  ;;  %v771_v52 = vsel %vm3868_vm10, %v3138_v51, %v753_v49  ;;  %1854 = vmatprep.subr.bf16.mxu1 %v1853_v25  ;;  %v1287_v53 = vsel %vm3869_vm13, %v3116_v26, %v1003_v24  ;;  %v2050_v45 = vpop.permute.xlu0 %2049 }
 0x190   : > { %v2037_v27 = vunpack.i.h.bf16 %v2035_v23  ;;  %v2036_v35 = vunpack.i.l.bf16 %v2035_v23  ;;  %v2042_v29 = vunpack.i.h.bf16 %v2040_v34  ;;  %v1867_v6 = vpack.c.bf16 %v1289_v56, %v1287_v53 }
 0x191   : > { %v769_v39 = vsel %vm3870_vm15, %v3069_v30, %v747_v50  ;;  %v2041_v2 = vunpack.i.l.bf16 %v2040_v34  ;;  %v2047_v21 = vunpack.i.h.bf16 %v2045_v14  ;;  %v1014_v43 = vsel %vm1010_vm1, %v2031_v18, %v2032_v42 }
 0x192   : > { %v1855_v62 = vpack.c.bf16 %v771_v52, %v769_v39  ;;  %vm3871_vm5 = vcmask 924672   ;;  %v2046_v25 = vunpack.i.l.bf16 %v2045_v14  ;;  %vm1170_vm11 = vcmask 785408   ;;  %1868 = vmatpush1.bf16.msra.mxu0 %v1867_v6  ;;  %v725_v14 = vpop.permute.xlu1 %724 }
 0x193   : > { %v681_v49 = vsel %vm3871_vm5, %v2036_v35, %v2037_v27  ;;  %v3872_v26 = vrot.slane %v2810_v60, %v2271_v17  ;;  %v765_v57 = vrot.slane %v3203_v31, 4  ;;  %v1056_v42 = vsel %vm1055_vm6, %v2041_v2, %v2042_v29  ;;  %vm3881_vm13 = vmmov %vm3871_vm5 }
 0x194   : > { %v3240_v30 = vsel %vm3791_vm3, %v681_v49, 0.0  ;;  %v1060_v18 = vsel %vm1055_vm6, %v2042_v29, %v2041_v2  ;;  %v3875_v34 = vrot.slane %v2798_v7, %v2265_v15  ;;  %v3878_v24 = vrot.slane %v2798_v7, %v2271_v17  ;;  %1856 = vmatpush1.bf16.msra.mxu1 %v1855_v62  ;;  %v2060_v49 = vpop.permute.xlu0 %2059 }
 0x195   : > { %vm3233_vm7 = vcmp.eq.s32.totalorder %v3872_v26, 1  ;;  %v766_v37 = vrot.slane %v3210_v0, 4  ;;  %v685_v52 = vsel %vm3881_vm13, %v2037_v27, %v2036_v35  ;;  %v1072_v53 = vsel %vm3162_vm14, %v1056_v42, 0.0  ;;  %v777_v27 = vld [vmem:[%s3532_s4] sm:$0xff] }
 0x196   : > { %vm3247_vm1 = vcmp.eq.s32.totalorder %v3875_v34, 1  ;;  %vm3254_vm10 = vcmp.eq.s32.totalorder %v3878_v24, 1  ;;  %v1073_v29 = vsel %vm3169_vm8, %v1060_v18, 0.0  ;;  %v1301_v6 = vrot.slane %v3240_v30, 4 }
 0x197   : > { %v3266_v7 = vsel %vm1078_vm4, %v2046_v25, %v2047_v21  ;;  %v2052_v39 = vunpack.i.h.bf16 %v2050_v45  ;;  %v2051_v2 = vunpack.i.l.bf16 %v2050_v45  ;;  %v3882_v62 = vrot.slane %v2803_v16, %v2265_v15 }
 0x198   : > { %v3275_v40 = vrot.slane %v1072_v53, 4  ;;  %v3277_v13 = vrot.slane %v1073_v29, 4  ;;  %v1027_v35 = vsel %vm3184_vm9, %v1011_v59, 0.0  ;;  %v1026_v26 = vsel %vm3191_vm0, %v1014_v43, 0.0  ;;  %vm3891_vm9 = vmmov %vm3870_vm15  ;;  %v2055_v53 = vpop.permute.xlu1 %2054 }
 0x199   : > { %vm3271_vm6 = vcmp.eq.s32.totalorder %v3882_v62, 1  ;;  %v3885_v45 = vrot.slane %v2803_v16, %v2271_v17  ;;  %v3888_v18 = vrot.slane %v2810_v60, %v2265_v15  ;;  %v1292_v9 = vsel %vm3870_vm15, %v1262_v41, %v1027_v35  ;;  %vm3892_vm0 = vmmov %vm3891_vm9  ;;  %v2070_v35 = vpop.permute.xlu0 %2069 }
 0x19a   : > { %v1294_v36 = vsel %vm3891_vm9, %v3179_v28, %v3114_v19  ;;  %v1291_v16 = vsel %vm3892_vm0, %v1261_v63, %v1026_v26  ;;  %vm3893_vm5 = vmmov %vm3892_vm0  ;;  %vm3894_vm13 = vcmask 908288   ;;  %v3896_v19 = vrot.slane %v2815_v12, %v2271_v17 }
 0x19b   : > { %vm3286_vm14 = vcmp.eq.s32.totalorder %v3885_v45, 1  ;;  %vm3293_vm8 = vcmp.eq.s32.totalorder %v3888_v18, 1  ;;  %v1293_v59 = vsel %vm3893_vm5, %v3173_v47, %v3110_v48  ;;  %v1869_v43 = vpack.c.bf16 %v1294_v36, %v1292_v9  ;;  %vm3895_vm3 = vmmov %vm3894_vm13  ;;  %v3899_v47 = vld [vmem:[#allocation2_spill] sm:$0xff]  ;;  %v3912_v36 = vld [vmem:[#allocation9_spill] sm:$0xff] }
 0x19c   : > { %v1871_v60 = vpack.c.bf16 %v1293_v59, %v1291_v16  ;;  %v727_v24 = vsel %vm3894_vm13, %v2933_v5, %v725_v14  ;;  %v731_v41 = vsel %vm3895_vm3, %v725_v14, %v2933_v5  ;;  %vm3314_vm9 = vcmp.eq.s32.totalorder %v3896_v19, 1  ;;  %v3916_v16 = vld [vmem:[#allocation7_spill] sm:$0xff] }
 0x19d   : > { %v1083_v63 = vsel %vm1078_vm4, %v2047_v21, %v2046_v25  ;;  %v3320_v48 = vsel %vm1101_vm12, %v2051_v2, %v2052_v39  ;;  %vm3900_vm0 = vnez %v3899_v47  ;;  %v3328_v5 = vsel %vm3788_vm2, %v685_v52, 0.0  ;;  %1870 = vmatprep.subr.bf16.mxu0 %v1869_v43  ;;  %v3904_v25 = vld [vmem:[#allocation3_spill] sm:$0xff]  ;;  %vm3907_vm2 = vmmov %vm3893_vm5 }
 0x19e   : > { %v3324_v28 = vsel %vm3900_vm0, %v727_v24, 0.0  ;;  %v3901_v29 = vrot.slane %v2815_v12, %v2265_v15  ;;  %v3338_v21 = vsel %vm1101_vm12, %v2052_v39, %v2051_v2  ;;  %vm3905_vm4 = vnez %v3904_v25  ;;  %vm3908_vm5 = vmmov %vm3907_vm2  ;;  %1872 = vmatpush1.bf16.msra.mxu0 %v1871_v60 }
 0x19f   : > { %v3342_v62 = vsel %vm3905_vm4, %v731_v41, 0.0  ;;  %v774_v52 = vsel %vm3907_vm2, %v3906_v38, %v760_v33  ;;  %v776_v12 = vsel %vm3908_vm5, %v3328_v5, %v766_v37  ;;  %v3909_v26 = vrot.slane %v2884_v55, %v2271_v17  ;;  %vm3917_vm15 = vmmov %vm3908_vm5  ;;  %v2065_v41 = vpop.permute.xlu1 %2064 }
 0x1a0   : > { %vm3333_vm13 = vcmp.eq.s32.totalorder %v3901_v29, 1  ;;  %v1305_v2 = vrot.slane %v3324_v28, 4  ;;  %v1857_v45 = vpack.c.bf16 %v776_v12, %v774_v52  ;;  %v2062_v18 = vunpack.i.h.bf16 %v2060_v49 }
 0x1a1   : > { %vm3353_vm3 = vcmp.eq.s32.totalorder %v3909_v26, 1  ;;  %v2061_v9 = vunpack.i.l.bf16 %v2060_v49  ;;  %v3913_v33 = vrot.slane %v3912_v36, %v2271_v17  ;;  %v773_v59 = vsel %vm3908_vm5, %v3916_v16, %v759_v32  ;;  %v3918_v49 = vld [vmem:[#allocation8_spill] sm:$0xff] }
 0x1a2   : > { %v775_v43 = vsel %vm3917_vm15, %v3240_v30, %v765_v57  ;;  %v2057_v60 = vunpack.i.h.bf16 %v2055_v53  ;;  %v2056_v24 = vunpack.i.l.bf16 %v2055_v53  ;;  %v3919_v19 = vrot.slane %v3918_v49, %v2271_v17  ;;  %1858 = vmatprep.subr.bf16.mxu1 %v1857_v45 }
 0x1a3   : > { %vm3361_vm2 = vcmp.eq.s32.totalorder %v3913_v33, 1  ;;  %v1171_v52 = vsel %vm1170_vm11, %v2061_v9, %v2062_v18  ;;  %v1175_v12 = vsel %vm1170_vm11, %v2062_v18, %v2061_v9  ;;  %v1859_v26 = vpack.c.bf16 %v775_v43, %v773_v59  ;;  %v1215_v43 = vpop.permute.xlu1 %1214 }
 0x1a4   : > { %vm3374_vm12 = vcmp.eq.s32.totalorder %v3919_v19, 1  ;;  %v1096_v32 = vsel %vm3233_vm7, %v1083_v63, 0.0  ;;  %v1187_v57 = vsel %vm3247_vm1, %v1171_v52, 0.0  ;;  %v1188_v53 = vsel %vm3254_vm10, %v1175_v12, 0.0  ;;  %v1674_v19 = vld [vmem:[%s3536_s8] sm:$0xff] }
 0x1a5   : > { %vm3922_vm15 = vcmask 801792   ;;  %v3924_v45 = vrot.slane %v3912_v36, %v2265_v15  ;;  %vm3398_vm11 = vcmp.eq.s32.totalorder %v1203_v8, 1  ;;  %v1306_v50 = vrot.slane %v3342_v62, 4  ;;  %1860 = vmatpush1.bf16.msra.mxu1 %v1859_v26 }
 0x1a6   : > { %v1125_v17 = vsel %vm3922_vm15, %v2056_v24, %v2057_v60  ;;  %vm3923_vm5 = vmmov %vm3922_vm15  ;;  %v1302_v56 = vrot.slane %v3328_v5, 4  ;;  %v3404_v63 = vrot.slane %v1187_v57, 4  ;;  %v3929_v18 = vrot.slane %v3906_v38, 4  ;;  %v1213_v5 = vpop.permute.xlu0 %1212 }
 0x1a7   : > { %v1129_v33 = vsel %vm3923_vm5, %v2057_v60, %v2056_v24  ;;  %vm3391_vm0 = vcmp.eq.s32.totalorder %v3924_v45, 1  ;;  %vm3930_vm7 = vcmask 1043456   ;;  %v1318_v36 = vrot.slane %v1188_v53, 4 }
 0x1a8   : > { %v1296_v9 = vsel %vm3930_vm7, %v3929_v18, %v3177_v46  ;;  %vm3931_vm1 = vmmov %vm3930_vm7  ;;  %v1141_v55 = vsel %vm3271_vm6, %v1125_v17, 0.0  ;;  %v2072_v59 = vunpack.i.h.bf16 %v2070_v35  ;;  %v1142_v60 = vsel %vm3286_vm14, %v1129_v33, 0.0 }
 0x1a9   : > { %1840 = vmatprep.subr.msk.mxu1 %vm3931_vm1, %v3342_v62  ;;  %vm3932_vm10 = vmmov %vm3931_vm1  ;;  %v2071_v38 = vunpack.i.l.bf16 %v2070_v35  ;;  %v1095_v46 = vsel %vm3293_vm8, %v3266_v7, 0.0  ;;  %v3933_v62 = vrot.slane %v3918_v49, %v2265_v15  ;;  %v3936_v42 = vrot.slane %v3916_v16, 4 }
 0x1aa   : > { %v1298_v8 = vsel %vm3932_vm10, %v3277_v13, %v1096_v32  ;;  %vm3937_vm14 = vmmov %vm3931_vm1  ;;  %v2067_v7 = vunpack.i.h.bf16 %v2065_v41  ;;  %v2066_v52 = vunpack.i.l.bf16 %v2065_v41  ;;  %vm3939_vm8 = vcmask 777216   ;;  %v1634_v32 = vpop.permute.xlu1 %1633  ;;  %v1632_v14 = vpop.permute.xlu0 %1631 }
 0x1ab   : > { %v1873_v24 = vpack.c.bf16 %v1298_v8, %v1296_v9  ;;  %vm3427_vm6 = vcmp.eq.s32.totalorder %v3933_v62, 1  ;;  %v1295_v35 = vsel %vm3937_vm14, %v3936_v42, %v3152_v3  ;;  %vm3938_vm15 = vmmov %vm3931_vm1  ;;  %v1194_v12 = vsel %vm3939_vm8, %v2071_v38, %v2072_v59  ;;  %v3967_v9 = vld [vmem:[#allocation5_spill] sm:$0xff] }
 0x1ac   : > { %v1297_v34 = vsel %vm3938_vm15, %v3275_v40, %v1095_v46  ;;  %vm3940_vm5 = vmmov %vm3939_vm8  ;;  %v1119_v16 = vsel %vm3314_vm9, %v3338_v21, 0.0  ;;  %vm3943_vm10 = vcmask 793600   ;;  %v1118_v49 = vsel %vm3333_vm13, %v3320_v48, 0.0 }
 0x1ad   : > { %1874 = vmatprep.subr.bf16.mxu0 %v1873_v24  ;;  %v1198_v26 = vsel %vm3940_vm5, %v2072_v59, %v2071_v38  ;;  %vm3941_vm7 = vmmov %vm3931_vm1  ;;  %v1875_v15 = vpack.c.bf16 %v1297_v34, %v1295_v35  ;;  %vm3942_vm1 = vcmask 293888   ;;  %v1148_v3 = vsel %vm3943_vm10, %v2066_v52, %v2067_v7 }
 0x1ae   : > { %1841 = vmatpush1.msk.msra.mxu1 %vm3941_vm7, %v3324_v28  ;;  %vm3944_vm14 = vmmov %vm3943_vm10  ;;  %v3946_v51 = vpack.c.bf16 %v2983_v10, %v2980_v4  ;;  %vm3950_vm13 = vcmask 769024   ;;  %v3953_v39 = vmov 0.0   ;;  %v3955_v37 = vpack.c.bf16 %v3042_v20, %v3020_v11  ;;  %v782_v59 = vpop.permute.xlu1 %781 }
 0x1af   : > { %1886 = vmatprep.subr.bf16.mxu1 %v1885_v44  ;;  %1842 = vmatmul.mubr.msk.f32.vlgmr.msra.gmra.mrb[4].mxu1 %vm3942_vm1, %v777_v27  ;;  %v1152_v40 = vsel %vm3944_vm14, %v2067_v7, %v2066_v52  ;;  %vm3945_vm15 = vmmov %vm3941_vm7  ;;  %v1221_v10 = vsel %vm3950_vm13, %v1215_v43, %v1213_v5  ;;  %v1164_v53 = vsel %vm3391_vm0, %v1148_v3, 0.0  ;;  %v1210_v17 = vsel %vm3398_vm11, %v1194_v12, 0.0 }
 0x1b0   : > { %v1326_v41 = vsel %vm3945_vm15, %v1302_v56, %v3210_v0  ;;  %1876 = vmatpush1.bf16.msra.mxu0 %v1875_v15  ;;  %1888 = vmatpush1.bf16.msra.mxu1 %v3946_v51  ;;  %vm3947_vm9 = vmmov %vm3941_vm7  ;;  %v1211_v0 = vsel %vm3353_vm3, %v1198_v26, 0.0  ;;  %v1165_v30 = vsel %vm3361_vm2, %v1152_v40, 0.0  ;;  %vm3958_vm10 = vnez %v3899_v47  ;;  %v446_v56 = vpop.permute.xlu0 %445 }
 0x1b1   : > { %v1328_v54 = vsel %vm3947_vm9, %v1306_v50, %v1119_v16  ;;  %vm3948_vm8 = vmmov %vm3941_vm7  ;;  %1890 = vmatprep.subr.bf16.mxu1 %v1889_v1  ;;  %1754 = vmatprep.mubr.f32.mxu1 %v3953_v39  ;;  %vm3964_vm9 = vcmask 293888   ;;  %v1333_v50 = vld [vmem:[%s3534_s6] sm:$0xff] }
 0x1b2   : > { %v1325_v58 = vsel %vm3948_vm8, %v1301_v6, %v3203_v31  ;;  %vm3949_vm5 = vmmov %vm3941_vm7  ;;  %v1877_v48 = vpack.c.bf16 %v1328_v54, %v1326_v41  ;;  %v1312_v31 = vrot.slane %v1142_v60, 4  ;;  %v1234_v6 = vsel %vm3374_vm12, %v1221_v10, 0.0  ;;  %v1679_v27 = vpop.permute.xlu1 %1678 }
 0x1b3   : > { %v1327_v44 = vsel %vm3949_vm5, %v1305_v2, %v1118_v49  ;;  %vm3951_vm7 = vcmask 908288   ;;  %v1311_v2 = vrot.slane %v1141_v55, 4  ;;  %vm3954_vm3 = vmmov %vm3950_vm13  ;;  %v1324_v22 = vrot.slane %v1234_v6, 4 }
 0x1b4   : > { %v1879_v4 = vpack.c.bf16 %v1327_v44, %v1325_v58  ;;  %v1635_v28 = vsel %vm3951_vm7, %v1632_v14, %v1634_v32  ;;  %vm3952_vm1 = vmmov %vm3951_vm7  ;;  %1878 = vmatprep.subr.bf16.mxu0 %v1877_v48  ;;  %v1217_v61 = vsel %vm3954_vm3, %v1213_v5, %v1215_v43  ;;  %1892 = vmatpush1.bf16.msra.mxu1 %v3955_v37  ;;  %vm1340_vm8 = vcmask 818176   ;;  %v1338_v7 = vpop.permute.xlu0 %1337 }
 0x1b5   : > { %v1639_v21 = vsel %vm3952_vm1, %v1634_v32, %v1632_v14  ;;  %vm3956_vm12 = vmmov %vm3949_vm5  ;;  %v1640_v33 = vsel %vm3958_vm10, %v1635_v28, 0.0  ;;  %v1233_v23 = vsel %vm3427_vm6, %v1217_v61, 0.0 }
 0x1b6   : > { %v1641_v1 = vsel %vm3905_vm4, %v1639_v21, 0.0  ;;  %1880 = vmatpush1.bf16.msra.mxu0 %v1879_v4  ;;  %v1330_v29 = vsel %vm3956_vm12, %v1312_v31, %v1165_v30  ;;  %vm3957_vm2 = vmmov %vm3949_vm5  ;;  %v1323_v47 = vrot.slane %v1233_v23, 4 }
 0x1b7   : > { %v1332_v57 = vsel %vm3957_vm2, %v1318_v36, %v1211_v0  ;;  %vm3959_vm4 = vmmov %vm3957_vm2  ;;  %v536_v36 = vadd.f32 %v3967_v9, %v446_v56 }
 0x1b8   : > { %v1881_v25 = vpack.c.bf16 %v1332_v57, %v1330_v29  ;;  %v1329_v45 = vsel %vm3959_vm4, %v1311_v2, %v1164_v53  ;;  %vm3960_vm14 = vmmov %vm3957_vm2 }
 0x1b9   : > { %v1331_v11 = vsel %vm3960_vm14, %v3404_v63, %v1210_v17  ;;  %vm3961_vm15 = vmmov %vm3957_vm2  ;;  %v3966_v63 = vld [vmem:[#allocation4_spill] sm:$0xff]  ;;  %v545_v8 = vmax.f32 %v536_v36, 0.0 }
 0x1ba   : > { %1846 = vmatprep.subr.msk.mxu1 %vm3961_vm15, %v1641_v1  ;;  %v1883_v20 = vpack.c.bf16 %v1331_v11, %v1329_v45  ;;  %1882 = vmatprep.subr.bf16.mxu0 %v1881_v25  ;;  %vm3962_vm0 = vmmov %vm3957_vm2  ;;  %v534_v18 = vadd.f32 %v3966_v63, %v446_v56 }
 0x1bb   : > { %1847 = vmatpush1.msk.msra.mxu1 %vm3962_vm0, %v1640_v33  ;;  %vm3963_vm11 = vmmov %vm3962_vm0  ;;  %1764 = vst [vmem:[%s3515_s18 + $0x8] sm:$0xff] %v545_v8 }
 0x1bc   : > { %1884 = vmatpush1.bf16.msra.mxu0 %v1883_v20  ;;  %1848 = vmatmul.mubr.msk.f32.vlgmr.msra.gmra.mrb[6].mxu1 %vm3964_vm9, %v1674_v19  ;;  %vm3965_vm5 = vmmov %vm3962_vm0  ;;  %v544_v55 = vmax.f32 %v534_v18, 0.0 }
 0x1bd   : > { %1843 = vmatprep.subr.msk.mxu0 %vm3963_vm11, %v1324_v22 }
 0x1be   : > { %1763 = vst [vmem:[%s3515_s18] sm:$0xff] %v544_v55 }
 0x1c0   : > { %1844 = vmatpush1.msk.msra.mxu0 %vm3965_vm5, %v1323_v47 }
 0x1c1   : > { %1845 = vmatmul.mubr.msk.f32.vlgmr.msra.gmra.mrb[0].mxu0 %vm1340_vm8, %v1333_v50 }
 0x282   : > { %v860_v5 = vpop.f32.mrb[4].mxu1 }
 0x283   : > { %v861_v43 = vadd.f32 %v860_v5, %v782_v59  ;;  %v862_v60 = vpop.f32.mrb[5].mxu1 }
 0x284   : > { %v863_v24 = vadd.f32 %v862_v60, %v782_v59 }
 0x285   : > { %v865_v38 = vmax.f32 %v861_v43, 0.0 }
 0x286   : > { %v866_v46 = vmax.f32 %v863_v24, 0.0 }
 0x287   : > { %1765 = vst [vmem:[%s3515_s18 + $0x10] sm:$0xff] %v865_v38 }
 0x288   : > { %1766 = vst [vmem:[%s3515_s18 + $0x18] sm:$0xff] %v866_v46 }
 0x28f   : > { %v1756_v62 = vpop.f32.mrb[6].mxu1 }
 0x290   : > { %v1757_v13 = vadd.f32 %v1756_v62, %v1679_v27  ;;  %v1758_v42 = vpop.f32.mrb[7].mxu1 }
 0x291   : > { %v1759_v35 = vadd.f32 %v1758_v42, %v1679_v27 }
 0x292   : > { %v1761_v34 = vmax.f32 %v1757_v13, 0.0 }
 0x293   : > { %v1762_v12 = vmax.f32 %v1759_v35, 0.0 }
 0x294   : > { %v1414_v52 = vpop.f32.mrb[0].mxu0  ;;  %1769 = vst [vmem:[%s3515_s18 + $0x30] sm:$0xff] %v1761_v34 }
 0x295   : > { %v1415_v26 = vadd.f32 %v1414_v52, %v1338_v7  ;;  %v1416_v15 = vpop.f32.mrb[1].mxu0  ;;  %1770 = vst [vmem:[%s3515_s18 + $0x38] sm:$0xff] %v1762_v12 }
 0x296   : > { %v1417_v16 = vadd.f32 %v1416_v15, %v1338_v7 }
 0x297   : > { %v1419_v3 = vmax.f32 %v1415_v26, 0.0 }
 0x298   : > { %v1420_v40 = vmax.f32 %v1417_v16, 0.0 }
 0x299   : > { %1767 = vst [vmem:[%s3515_s18 + $0x20] sm:$0xff] %v1419_v3 }
 0x29a   : > { %1768 = vst [vmem:[%s3515_s18 + $0x28] sm:$0xff] %v1420_v40 }
 0x29b PF: > { %s20_s13 = sadd.s32 1, %s2081_s13  }
 0x29c   : > { %p17_p4 = scmp.ge.s32.totalorder %s20_s13, 4  }
 0x29e   :  { %19 = sbr.rel (!%p17_p4) target bundleno = 1 (0x1), region = 91 }

</bundles_post_ra>
